<compile_context>
chip_gen: v7x
topology: tpu7x:2x2x1
jax: 0.10.0
libtpu: 0.0.40
codegen_flags: <defaults>
</compile_context>

<pallas_src>
import functools

import jax
import jax.numpy as jnp
from jax import lax
from jax.experimental import pallas as pl
from jax.experimental.pallas import tpu as pltpu


# ----------------------------------------------------------------------------
# Helpers
# ----------------------------------------------------------------------------
def _full_spec(shape):
    # Whole-array block (exempt from the (8,128) divisibility rule).
    return pl.BlockSpec(shape, lambda: (0,) * len(shape))


def _round_up(x, m):
    return (x + m - 1) // m * m


def _geometry(N, H, W):
    """Flattened, spatially padded, guard-banded layout geometry."""
    Hp, Wp = H + 2, W + 2                       # zero-padded spatial dims
    Mp = N * Hp * Wp                            # flattened padded positions
    m_pad = _round_up(Mp, 128)                  # lane-dense compute width
    guard = 128                                 # guard band for tap shifts
    assert guard >= Wp + 1, "guard band too small for 3x3 tap shifts"
    Mtot = guard + m_pad + guard
    # Lane offset of tap (kh, kw) relative to the output position.
    taps = tuple((kh - 1) * Wp + (kw - 1) for kh in range(3) for kw in range(3))
    return Hp, Wp, Mp, m_pad, guard, Mtot, taps


# ----------------------------------------------------------------------------
# Fused Pallas kernel: stage -> conv1+ReLU -> conv2+ReLU -> avg-pool -> FC
# ----------------------------------------------------------------------------
def _fused_cnn_kernel(x_ref, w1_ref, b1_ref, w2_ref, b2_ref, mask_ref,
                      pool_ref, wfc_ref, bfc_ref, o_ref,
                      xbuf_ref, xstk_ref, h1_ref, hstk_ref,
                      *, taps, m_pad, guard, N, Cin, H, W, Hp, Wp):
    """
    x_ref   : (N, Cin, H, W)      f32   raw NCHW input (staged in-kernel)
    w1_ref  : (C1, 9*cin_p)       bf16  conv1 weights, tap-stacked along K
    b1_ref  : (C1, 1)             f32
    w2_ref  : (C2, 9*C1)          bf16  conv2 weights, tap-stacked along K
    b2_ref  : (C2, 1)             f32
    mask_ref: (1, m_pad)          f32   1.0 at valid (interior) positions
    pool_ref: (N, m_pad)          bf16  lane-dense per-image masked-mean matrix
    wfc_ref : (C2, ncls)          f32   FC weight
    bfc_ref : (1, ncls)           f32
    o_ref   : (N, ncls)           f32   logits
    xbuf_ref: (cin_p, Mtot)       bf16  scratch: guard-banded padded input
    xstk_ref: (9*cin_p, m_pad)    bf16  scratch: conv1 tap-stacked operand
    h1_ref  : (C1, Mtot)          bf16  scratch: conv1 output, guard-banded
    hstk_ref: (9*C1, m_pad)       bf16  scratch: conv2 tap-stacked operand
    """
    g = guard
    cin_p = xbuf_ref.shape[0]
    C1 = h1_ref.shape[0]

    # ---- in-kernel staging: NCHW f32 -> zero-padded, channel-major, ----
    # ---- flattened, guard-banded bf16 buffer.                        ----
    # Full zero guarantees guards, spatial padding, channel-pad rows and the
    # [Mp, m_pad) tail are exactly zero (conv padding semantics rely on it).
    xbuf_ref[...] = jnp.zeros_like(xbuf_ref)
    for n in range(N):
        img = x_ref[n]                                            # (Cin, H, W)
        for h in range(H):
            base = g + n * Hp * Wp + (h + 1) * Wp + 1
            xbuf_ref[0:Cin, base:base + W] = img[:, h, :].astype(xbuf_ref.dtype)

    # ---- conv1: stack 9 taps along the contraction dim, ONE matmul ----
    for t, d in enumerate(taps):
        xstk_ref[t * cin_p:(t + 1) * cin_p, :] = xbuf_ref[:, g + d:g + d + m_pad]
    acc1 = jnp.dot(w1_ref[...], xstk_ref[...],
                   preferred_element_type=jnp.float32)            # (C1, m_pad)
    # bias + ReLU; zero the non-interior positions so this is directly the
    # zero-padded input of conv2.
    y1 = jnp.maximum(acc1 + b1_ref[...], 0.0) * mask_ref[...]

    # Stage conv1 output into the guard-banded scratch.  Only the guard
    # stripes need zeroing: the interior store covers all of [g, g+m_pad).
    h1_ref[:, 0:g] = jnp.zeros((C1, g), h1_ref.dtype)
    h1_ref[:, g + m_pad:g + m_pad + g] = jnp.zeros((C1, g), h1_ref.dtype)
    h1_ref[:, g:g + m_pad] = y1.astype(h1_ref.dtype)

    # ---- conv2: same single tap-stacked matmul on the VMEM-resident h1 ----
    for t, d in enumerate(taps):
        hstk_ref[t * C1:(t + 1) * C1, :] = h1_ref[:, g + d:g + d + m_pad]
    acc2 = jnp.dot(w2_ref[...], hstk_ref[...],
                   preferred_element_type=jnp.float32)            # (C2, m_pad)
    y2 = jnp.maximum(acc2 + b2_ref[...], 0.0)

    # ---- global average pool (masked, per image): lane-dense bf16 ----
    # ---- pooling matrix, contract the last dims of both operands. ----
    pooled = lax.dot_general(
        y2.astype(jnp.bfloat16), pool_ref[...],
        dimension_numbers=(((1,), (1,)), ((), ())),
        preferred_element_type=jnp.float32)                       # (C2, N)

    # ---- FC epilogue: logits emitted directly as (N, ncls) ----
    logits = lax.dot_general(
        pooled, wfc_ref[...],
        dimension_numbers=(((0,), (0,)), ((), ())),
        preferred_element_type=jnp.float32)                       # (N, ncls)
    o_ref[...] = logits + bfc_ref[...]


# ----------------------------------------------------------------------------
# Parameter initialization and one-time repacking (outside the hot path)
# ----------------------------------------------------------------------------
def init_params(key, in_ch=3, mid_ch=8, out_ch=16, num_classes=10):
    ks = jax.random.split(key, 6)
    return {
        "conv1_w": jax.random.normal(ks[0], (mid_ch, in_ch, 3, 3), jnp.float32) * 0.1,
        "conv1_b": jax.random.normal(ks[1], (mid_ch,), jnp.float32) * 0.1,
        "conv2_w": jax.random.normal(ks[2], (out_ch, mid_ch, 3, 3), jnp.float32) * 0.1,
        "conv2_b": jax.random.normal(ks[3], (out_ch,), jnp.float32) * 0.1,
        "fc_w": jax.random.normal(ks[4], (out_ch, num_classes), jnp.float32) * 0.1,
        "fc_b": jax.random.normal(ks[5], (num_classes,), jnp.float32) * 0.1,
    }


def prepare_params(params, input_shape):
    """Repack weights into the kernel layout (tap-stacked along K, bf16 MXU
    operands) and precompute the interior mask / pooling matrix.  Runs once."""
    N, Cin, H, W = input_shape
    Hp, Wp, Mp, m_pad, guard, Mtot, taps = _geometry(N, H, W)
    del guard, Mtot, taps
    C1 = params["conv1_w"].shape[0]
    C2 = params["conv2_w"].shape[0]
    ncls = params["fc_w"].shape[1]
    cin_p = max(8, _round_up(Cin, 8))   # pad input channels for clean MXU tiles

    # (Cout, Cin, 3, 3) -> (Cout, 9*cin_pad) with w[o, t*cin_pad + c] =
    # conv_w[o, c, kh, kw], t = kh*3 + kw (matches the kernel's stacking).
    def stack_taps(w, cin_pad):
        cout, cin = w.shape[0], w.shape[1]
        wt = jnp.transpose(w, (0, 2, 3, 1)).reshape(cout, 9, cin)
        wp = jnp.zeros((cout, 9, cin_pad), jnp.bfloat16)
        wp = wp.at[:, :, :cin].set(wt.astype(jnp.bfloat16))
        return wp.reshape(cout, 9 * cin_pad)

    w1s = stack_taps(params["conv1_w"], cin_p)                    # (C1, 9*cin_p)
    w2s = stack_taps(params["conv2_w"], C1)                       # (C2, 9*C1)

    # Interior mask + lane-dense transposed per-image masked-mean pooling
    # matrix over the flattened padded layout p = n*Hp*Wp + h*Wp + w
    # (valid iff 1<=h<=H, 1<=w<=W).
    p_idx = jnp.arange(m_pad)
    h_idx = (p_idx // Wp) % Hp
    w_idx = p_idx % Wp
    n_idx = p_idx // (Hp * Wp)
    interior = ((p_idx < Mp) & (h_idx >= 1) & (h_idx <= H)
                & (w_idx >= 1) & (w_idx <= W))
    mask = interior.astype(jnp.float32).reshape(1, m_pad)
    pool_t = interior[None, :] & (n_idx[None, :] == jnp.arange(N)[:, None])
    # 1/(H*W) = 1/256 is exactly representable in bf16.
    pool_t = (pool_t.astype(jnp.float32) / float(H * W)).astype(jnp.bfloat16)

    return {
        "w1": w1s,
        "b1": params["conv1_b"].reshape(C1, 1).astype(jnp.float32),
        "w2": w2s,
        "b2": params["conv2_b"].reshape(C2, 1).astype(jnp.float32),
        "mask": mask,                                             # (1, m_pad)
        "pool_t": pool_t,                                         # (N, m_pad)
        "wfc": params["fc_w"].astype(jnp.float32),                # (C2, ncls)
        "bfc": params["fc_b"].reshape(1, ncls).astype(jnp.float32),
    }


# ----------------------------------------------------------------------------
# Master_analyzer forward (pass-through to the wrapped model)
# ----------------------------------------------------------------------------
@jax.jit
def master_analyzer_forward(x_nchw, prepared):
    # == Master_analyzer.forward(x): return self.model(x) ==
    N, Cin, H, W = x_nchw.shape
    Hp, Wp, Mp, m_pad, guard, Mtot, taps = _geometry(N, H, W)
    C1 = prepared["b1"].shape[0]
    cin_p = prepared["w1"].shape[1] // 9
    C2 = prepared["b2"].shape[0]
    ncls = prepared["bfc"].shape[1]

    kernel = functools.partial(
        _fused_cnn_kernel, taps=taps, m_pad=m_pad, guard=guard,
        N=N, Cin=Cin, H=H, W=W, Hp=Hp, Wp=Wp)

    logits = pl.pallas_call(
        kernel,
        out_shape=jax.ShapeDtypeStruct((N, ncls), jnp.float32),
        in_specs=[
            _full_spec((N, Cin, H, W)),     # x (raw NCHW, staged in-kernel)
            _full_spec((C1, 9 * cin_p)),    # w1 (tap-stacked)
            _full_spec((C1, 1)),            # b1
            _full_spec((C2, 9 * C1)),       # w2 (tap-stacked)
            _full_spec((C2, 1)),            # b2
            _full_spec((1, m_pad)),         # interior mask
            _full_spec((N, m_pad)),         # pooling matrix (lane-dense)
            _full_spec((C2, ncls)),         # fc weight
            _full_spec((1, ncls)),          # fc bias
        ],
        out_specs=_full_spec((N, ncls)),
        scratch_shapes=[
            pltpu.VMEM((cin_p, Mtot), jnp.bfloat16),        # padded input
            pltpu.VMEM((9 * cin_p, m_pad), jnp.bfloat16),   # conv1 tap stack
            pltpu.VMEM((C1, Mtot), jnp.bfloat16),           # conv1 output
            pltpu.VMEM((9 * C1, m_pad), jnp.bfloat16),      # conv2 tap stack
        ],
    )(x_nchw, prepared["w1"], prepared["b1"], prepared["w2"], prepared["b2"],
      prepared["mask"], prepared["pool_t"], prepared["wfc"], prepared["bfc"])

    return logits                                                 # (N, ncls)


# Pure-JAX f32 reference for correctness checking.
def _reference_forward(x, params):
    def conv(x, w, b):
        y = lax.conv_general_dilated(
            x, w, window_strides=(1, 1), padding="SAME",
            dimension_numbers=("NCHW", "OIHW", "NCHW"))
        return jnp.maximum(y + b.reshape(1, -1, 1, 1), 0.0)

    h = conv(x, params["conv1_w"], params["conv1_b"])
    h = conv(h, params["conv2_w"], params["conv2_b"])
    pooled = jnp.mean(h, axis=(2, 3))
    return pooled @ params["fc_w"] + params["fc_b"]


if __name__ == "__main__":
    key = jax.random.PRNGKey(0)
    k_in, k_par = jax.random.split(key)

    # Small NCHW input consistent with input_size=(1, 3, 32, 32) semantics.
    x = jax.random.normal(k_in, (2, 3, 16, 16), jnp.float32)
    params = init_params(k_par)
    prepared = prepare_params(params, x.shape)

    out = jax.block_until_ready(master_analyzer_forward(x, prepared))
    ref = jax.block_until_ready(_reference_forward(x, params))

    assert out.shape == (2, 10), out.shape
    # bf16 MXU operands (f32 accumulation) -> loosen tolerance vs f32 reference.
    max_err = float(jnp.max(jnp.abs(out - ref)))
    assert jnp.allclose(out, ref, atol=2e-2, rtol=2e-2), (
        "mismatch vs reference", max_err)

    print("KERNEL_OK")
</pallas_src>

<mosaic_0001>
module attributes {stable_mosaic.version = 11 : i64} {
  func.func @_fused_cnn_kernel(%arg0: memref<2x3x16x16xf32, #tpu.memory_space<vmem>>, %arg1: memref<8x72xbf16, #tpu.memory_space<vmem>>, %arg2: memref<8x1xf32, #tpu.memory_space<vmem>>, %arg3: memref<16x72xbf16, #tpu.memory_space<vmem>>, %arg4: memref<16x1xf32, #tpu.memory_space<vmem>>, %arg5: memref<1x768xf32, #tpu.memory_space<vmem>>, %arg6: memref<2x768xbf16, #tpu.memory_space<vmem>>, %arg7: memref<16x10xf32, #tpu.memory_space<vmem>>, %arg8: memref<1x10xf32, #tpu.memory_space<vmem>>, %arg9: memref<2x10xf32, #tpu.memory_space<vmem>>, %arg10: memref<8x1024xbf16, #tpu.memory_space<vmem>>, %arg11: memref<72x768xbf16, #tpu.memory_space<vmem>>, %arg12: memref<8x1024xbf16, #tpu.memory_space<vmem>>, %arg13: memref<72x768xbf16, #tpu.memory_space<vmem>>) attributes {dimension_semantics = [], scalar_prefetch = 0 : i64, scratch_operands = 4 : i64, tpu.core_type = #tpu.core_type<tc>} {
    %cst = arith.constant 0.000000e+00 : bf16
    %0 = vector.broadcast %cst : bf16 to vector<8x1024xbf16>
    %c0 = arith.constant 0 : index
    %c0_0 = arith.constant 0 : index
    %1 = vector.load %arg10[%c0, %c0_0] : memref<8x1024xbf16, #tpu.memory_space<vmem>>, vector<8x1024xbf16>
    tpu.vector_store %arg10[%c0, %c0_0], %0 {strides = array<i32>} : memref<8x1024xbf16, #tpu.memory_space<vmem>>, vector<8x1024xbf16>,
    %c0_1 = arith.constant 0 : index
    %c0_2 = arith.constant 0 : index
    %c0_3 = arith.constant 0 : index
    %c0_4 = arith.constant 0 : index
    %2 = vector.load %arg0[%c0_1, %c0_2, %c0_3, %c0_4] : memref<2x3x16x16xf32, #tpu.memory_space<vmem>>, vector<1x3x16x16xf32>
    %3 = vector.shape_cast %2 : vector<1x3x16x16xf32> to vector<3x16x16xf32>
    %4 = vector.extract_strided_slice %3 {offsets = [0, 0, 0], sizes = [3, 1, 16], strides = [1, 1, 1]} : vector<3x16x16xf32> to vector<3x1x16xf32>
    %5 = vector.shape_cast %4 : vector<3x1x16xf32> to vector<3x16xf32>
    %6 = arith.truncf %5 : vector<3x16xf32> to vector<3x16xbf16>
    %c0_5 = arith.constant 0 : index
    %c147 = arith.constant 147 : index
    %7 = vector.load %arg10[%c0_5, %c147] : memref<8x1024xbf16, #tpu.memory_space<vmem>>, vector<3x16xbf16>
    tpu.vector_store %arg10[%c0_5, %c147], %6 {strides = array<i32>} : memref<8x1024xbf16, #tpu.memory_space<vmem>>, vector<3x16xbf16>,
    %8 = vector.extract_strided_slice %3 {offsets = [0, 1, 0], sizes = [3, 1, 16], strides = [1, 1, 1]} : vector<3x16x16xf32> to vector<3x1x16xf32>
    %9 = vector.shape_cast %8 : vector<3x1x16xf32> to vector<3x16xf32>
    %10 = arith.truncf %9 : vector<3x16xf32> to vector<3x16xbf16>
    %c0_6 = arith.constant 0 : index
    %c165 = arith.constant 165 : index
    %11 = vector.load %arg10[%c0_6, %c165] : memref<8x1024xbf16, #tpu.memory_space<vmem>>, vector<3x16xbf16>
    tpu.vector_store %arg10[%c0_6, %c165], %10 {strides = array<i32>} : memref<8x1024xbf16, #tpu.memory_space<vmem>>, vector<3x16xbf16>,
    %12 = vector.extract_strided_slice %3 {offsets = [0, 2, 0], sizes = [3, 1, 16], strides = [1, 1, 1]} : vector<3x16x16xf32> to vector<3x1x16xf32>
    %13 = vector.shape_cast %12 : vector<3x1x16xf32> to vector<3x16xf32>
    %14 = arith.truncf %13 : vector<3x16xf32> to vector<3x16xbf16>
    %c0_7 = arith.constant 0 : index
    %c183 = arith.constant 183 : index
    %15 = vector.load %arg10[%c0_7, %c183] : memref<8x1024xbf16, #tpu.memory_space<vmem>>, vector<3x16xbf16>
    tpu.vector_store %arg10[%c0_7, %c183], %14 {strides = array<i32>} : memref<8x1024xbf16, #tpu.memory_space<vmem>>, vector<3x16xbf16>,
    %16 = vector.extract_strided_slice %3 {offsets = [0, 3, 0], sizes = [3, 1, 16], strides = [1, 1, 1]} : vector<3x16x16xf32> to vector<3x1x16xf32>
    %17 = vector.shape_cast %16 : vector<3x1x16xf32> to vector<3x16xf32>
    %18 = arith.truncf %17 : vector<3x16xf32> to vector<3x16xbf16>
    %c0_8 = arith.constant 0 : index
    %c201 = arith.constant 201 : index
    %19 = vector.load %arg10[%c0_8, %c201] : memref<8x1024xbf16, #tpu.memory_space<vmem>>, vector<3x16xbf16>
    tpu.vector_store %arg10[%c0_8, %c201], %18 {strides = array<i32>} : memref<8x1024xbf16, #tpu.memory_space<vmem>>, vector<3x16xbf16>,
    %20 = vector.extract_strided_slice %3 {offsets = [0, 4, 0], sizes = [3, 1, 16], strides = [1, 1, 1]} : vector<3x16x16xf32> to vector<3x1x16xf32>
    %21 = vector.shape_cast %20 : vector<3x1x16xf32> to vector<3x16xf32>
    %22 = arith.truncf %21 : vector<3x16xf32> to vector<3x16xbf16>
    %c0_9 = arith.constant 0 : index
    %c219 = arith.constant 219 : index
    %23 = vector.load %arg10[%c0_9, %c219] : memref<8x1024xbf16, #tpu.memory_space<vmem>>, vector<3x16xbf16>
    tpu.vector_store %arg10[%c0_9, %c219], %22 {strides = array<i32>} : memref<8x1024xbf16, #tpu.memory_space<vmem>>, vector<3x16xbf16>,
    %24 = vector.extract_strided_slice %3 {offsets = [0, 5, 0], sizes = [3, 1, 16], strides = [1, 1, 1]} : vector<3x16x16xf32> to vector<3x1x16xf32>
    %25 = vector.shape_cast %24 : vector<3x1x16xf32> to vector<3x16xf32>
    %26 = arith.truncf %25 : vector<3x16xf32> to vector<3x16xbf16>
    %c0_10 = arith.constant 0 : index
    %c237 = arith.constant 237 : index
    %27 = vector.load %arg10[%c0_10, %c237] : memref<8x1024xbf16, #tpu.memory_space<vmem>>, vector<3x16xbf16>
    tpu.vector_store %arg10[%c0_10, %c237], %26 {strides = array<i32>} : memref<8x1024xbf16, #tpu.memory_space<vmem>>, vector<3x16xbf16>,
    %28 = vector.extract_strided_slice %3 {offsets = [0, 6, 0], sizes = [3, 1, 16], strides = [1, 1, 1]} : vector<3x16x16xf32> to vector<3x1x16xf32>
    %29 = vector.shape_cast %28 : vector<3x1x16xf32> to vector<3x16xf32>
    %30 = arith.truncf %29 : vector<3x16xf32> to vector<3x16xbf16>
    %c0_11 = arith.constant 0 : index
    %c255 = arith.constant 255 : index
    %31 = vector.load %arg10[%c0_11, %c255] : memref<8x1024xbf16, #tpu.memory_space<vmem>>, vector<3x16xbf16>
    tpu.vector_store %arg10[%c0_11, %c255], %30 {strides = array<i32>} : memref<8x1024xbf16, #tpu.memory_space<vmem>>, vector<3x16xbf16>,
    %32 = vector.extract_strided_slice %3 {offsets = [0, 7, 0], sizes = [3, 1, 16], strides = [1, 1, 1]} : vector<3x16x16xf32> to vector<3x1x16xf32>
    %33 = vector.shape_cast %32 : vector<3x1x16xf32> to vector<3x16xf32>
    %34 = arith.truncf %33 : vector<3x16xf32> to vector<3x16xbf16>
    %c0_12 = arith.constant 0 : index
    %c273 = arith.constant 273 : index
    %35 = vector.load %arg10[%c0_12, %c273] : memref<8x1024xbf16, #tpu.memory_space<vmem>>, vector<3x16xbf16>
    tpu.vector_store %arg10[%c0_12, %c273], %34 {strides = array<i32>} : memref<8x1024xbf16, #tpu.memory_space<vmem>>, vector<3x16xbf16>,
    %36 = vector.extract_strided_slice %3 {offsets = [0, 8, 0], sizes = [3, 1, 16], strides = [1, 1, 1]} : vector<3x16x16xf32> to vector<3x1x16xf32>
    %37 = vector.shape_cast %36 : vector<3x1x16xf32> to vector<3x16xf32>
    %38 = arith.truncf %37 : vector<3x16xf32> to vector<3x16xbf16>
    %c0_13 = arith.constant 0 : index
    %c291 = arith.constant 291 : index
    %39 = vector.load %arg10[%c0_13, %c291] : memref<8x1024xbf16, #tpu.memory_space<vmem>>, vector<3x16xbf16>
    tpu.vector_store %arg10[%c0_13, %c291], %38 {strides = array<i32>} : memref<8x1024xbf16, #tpu.memory_space<vmem>>, vector<3x16xbf16>,
    %40 = vector.extract_strided_slice %3 {offsets = [0, 9, 0], sizes = [3, 1, 16], strides = [1, 1, 1]} : vector<3x16x16xf32> to vector<3x1x16xf32>
    %41 = vector.shape_cast %40 : vector<3x1x16xf32> to vector<3x16xf32>
    %42 = arith.truncf %41 : vector<3x16xf32> to vector<3x16xbf16>
    %c0_14 = arith.constant 0 : index
    %c309 = arith.constant 309 : index
    %43 = vector.load %arg10[%c0_14, %c309] : memref<8x1024xbf16, #tpu.memory_space<vmem>>, vector<3x16xbf16>
    tpu.vector_store %arg10[%c0_14, %c309], %42 {strides = array<i32>} : memref<8x1024xbf16, #tpu.memory_space<vmem>>, vector<3x16xbf16>,
    %44 = vector.extract_strided_slice %3 {offsets = [0, 10, 0], sizes = [3, 1, 16], strides = [1, 1, 1]} : vector<3x16x16xf32> to vector<3x1x16xf32>
    %45 = vector.shape_cast %44 : vector<3x1x16xf32> to vector<3x16xf32>
    %46 = arith.truncf %45 : vector<3x16xf32> to vector<3x16xbf16>
    %c0_15 = arith.constant 0 : index
    %c327 = arith.constant 327 : index
    %47 = vector.load %arg10[%c0_15, %c327] : memref<8x1024xbf16, #tpu.memory_space<vmem>>, vector<3x16xbf16>
    tpu.vector_store %arg10[%c0_15, %c327], %46 {strides = array<i32>} : memref<8x1024xbf16, #tpu.memory_space<vmem>>, vector<3x16xbf16>,
    %48 = vector.extract_strided_slice %3 {offsets = [0, 11, 0], sizes = [3, 1, 16], strides = [1, 1, 1]} : vector<3x16x16xf32> to vector<3x1x16xf32>
    %49 = vector.shape_cast %48 : vector<3x1x16xf32> to vector<3x16xf32>
    %50 = arith.truncf %49 : vector<3x16xf32> to vector<3x16xbf16>
    %c0_16 = arith.constant 0 : index
    %c345 = arith.constant 345 : index
    %51 = vector.load %arg10[%c0_16, %c345] : memref<8x1024xbf16, #tpu.memory_space<vmem>>, vector<3x16xbf16>
    tpu.vector_store %arg10[%c0_16, %c345], %50 {strides = array<i32>} : memref<8x1024xbf16, #tpu.memory_space<vmem>>, vector<3x16xbf16>,
    %52 = vector.extract_strided_slice %3 {offsets = [0, 12, 0], sizes = [3, 1, 16], strides = [1, 1, 1]} : vector<3x16x16xf32> to vector<3x1x16xf32>
    %53 = vector.shape_cast %52 : vector<3x1x16xf32> to vector<3x16xf32>
    %54 = arith.truncf %53 : vector<3x16xf32> to vector<3x16xbf16>
    %c0_17 = arith.constant 0 : index
    %c363 = arith.constant 363 : index
    %55 = vector.load %arg10[%c0_17, %c363] : memref<8x1024xbf16, #tpu.memory_space<vmem>>, vector<3x16xbf16>
    tpu.vector_store %arg10[%c0_17, %c363], %54 {strides = array<i32>} : memref<8x1024xbf16, #tpu.memory_space<vmem>>, vector<3x16xbf16>,
    %56 = vector.extract_strided_slice %3 {offsets = [0, 13, 0], sizes = [3, 1, 16], strides = [1, 1, 1]} : vector<3x16x16xf32> to vector<3x1x16xf32>
    %57 = vector.shape_cast %56 : vector<3x1x16xf32> to vector<3x16xf32>
    %58 = arith.truncf %57 : vector<3x16xf32> to vector<3x16xbf16>
    %c0_18 = arith.constant 0 : index
    %c381 = arith.constant 381 : index
    %59 = vector.load %arg10[%c0_18, %c381] : memref<8x1024xbf16, #tpu.memory_space<vmem>>, vector<3x16xbf16>
    tpu.vector_store %arg10[%c0_18, %c381], %58 {strides = array<i32>} : memref<8x1024xbf16, #tpu.memory_space<vmem>>, vector<3x16xbf16>,
    %60 = vector.extract_strided_slice %3 {offsets = [0, 14, 0], sizes = [3, 1, 16], strides = [1, 1, 1]} : vector<3x16x16xf32> to vector<3x1x16xf32>
    %61 = vector.shape_cast %60 : vector<3x1x16xf32> to vector<3x16xf32>
    %62 = arith.truncf %61 : vector<3x16xf32> to vector<3x16xbf16>
    %c0_19 = arith.constant 0 : index
    %c399 = arith.constant 399 : index
    %63 = vector.load %arg10[%c0_19, %c399] : memref<8x1024xbf16, #tpu.memory_space<vmem>>, vector<3x16xbf16>
    tpu.vector_store %arg10[%c0_19, %c399], %62 {strides = array<i32>} : memref<8x1024xbf16, #tpu.memory_space<vmem>>, vector<3x16xbf16>,
    %64 = vector.extract_strided_slice %3 {offsets = [0, 15, 0], sizes = [3, 1, 16], strides = [1, 1, 1]} : vector<3x16x16xf32> to vector<3x1x16xf32>
    %65 = vector.shape_cast %64 : vector<3x1x16xf32> to vector<3x16xf32>
    %66 = arith.truncf %65 : vector<3x16xf32> to vector<3x16xbf16>
    %c0_20 = arith.constant 0 : index
    %c417 = arith.constant 417 : index
    %67 = vector.load %arg10[%c0_20, %c417] : memref<8x1024xbf16, #tpu.memory_space<vmem>>, vector<3x16xbf16>
    tpu.vector_store %arg10[%c0_20, %c417], %66 {strides = array<i32>} : memref<8x1024xbf16, #tpu.memory_space<vmem>>, vector<3x16xbf16>,
    %c1 = arith.constant 1 : index
    %c0_21 = arith.constant 0 : index
    %c0_22 = arith.constant 0 : index
    %c0_23 = arith.constant 0 : index
    %68 = vector.load %arg0[%c1, %c0_21, %c0_22, %c0_23] : memref<2x3x16x16xf32, #tpu.memory_space<vmem>>, vector<1x3x16x16xf32>
    %69 = vector.shape_cast %68 : vector<1x3x16x16xf32> to vector<3x16x16xf32>
    %70 = vector.extract_strided_slice %69 {offsets = [0, 0, 0], sizes = [3, 1, 16], strides = [1, 1, 1]} : vector<3x16x16xf32> to vector<3x1x16xf32>
    %71 = vector.shape_cast %70 : vector<3x1x16xf32> to vector<3x16xf32>
    %72 = arith.truncf %71 : vector<3x16xf32> to vector<3x16xbf16>
    %c0_24 = arith.constant 0 : index
    %c471 = arith.constant 471 : index
    %73 = vector.load %arg10[%c0_24, %c471] : memref<8x1024xbf16, #tpu.memory_space<vmem>>, vector<3x16xbf16>
    tpu.vector_store %arg10[%c0_24, %c471], %72 {strides = array<i32>} : memref<8x1024xbf16, #tpu.memory_space<vmem>>, vector<3x16xbf16>,
    %74 = vector.extract_strided_slice %69 {offsets = [0, 1, 0], sizes = [3, 1, 16], strides = [1, 1, 1]} : vector<3x16x16xf32> to vector<3x1x16xf32>
    %75 = vector.shape_cast %74 : vector<3x1x16xf32> to vector<3x16xf32>
    %76 = arith.truncf %75 : vector<3x16xf32> to vector<3x16xbf16>
    %c0_25 = arith.constant 0 : index
    %c489 = arith.constant 489 : index
    %77 = vector.load %arg10[%c0_25, %c489] : memref<8x1024xbf16, #tpu.memory_space<vmem>>, vector<3x16xbf16>
    tpu.vector_store %arg10[%c0_25, %c489], %76 {strides = array<i32>} : memref<8x1024xbf16, #tpu.memory_space<vmem>>, vector<3x16xbf16>,
    %78 = vector.extract_strided_slice %69 {offsets = [0, 2, 0], sizes = [3, 1, 16], strides = [1, 1, 1]} : vector<3x16x16xf32> to vector<3x1x16xf32>
    %79 = vector.shape_cast %78 : vector<3x1x16xf32> to vector<3x16xf32>
    %80 = arith.truncf %79 : vector<3x16xf32> to vector<3x16xbf16>
    %c0_26 = arith.constant 0 : index
    %c507 = arith.constant 507 : index
    %81 = vector.load %arg10[%c0_26, %c507] : memref<8x1024xbf16, #tpu.memory_space<vmem>>, vector<3x16xbf16>
    tpu.vector_store %arg10[%c0_26, %c507], %80 {strides = array<i32>} : memref<8x1024xbf16, #tpu.memory_space<vmem>>, vector<3x16xbf16>,
    %82 = vector.extract_strided_slice %69 {offsets = [0, 3, 0], sizes = [3, 1, 16], strides = [1, 1, 1]} : vector<3x16x16xf32> to vector<3x1x16xf32>
    %83 = vector.shape_cast %82 : vector<3x1x16xf32> to vector<3x16xf32>
    %84 = arith.truncf %83 : vector<3x16xf32> to vector<3x16xbf16>
    %c0_27 = arith.constant 0 : index
    %c525 = arith.constant 525 : index
    %85 = vector.load %arg10[%c0_27, %c525] : memref<8x1024xbf16, #tpu.memory_space<vmem>>, vector<3x16xbf16>
    tpu.vector_store %arg10[%c0_27, %c525], %84 {strides = array<i32>} : memref<8x1024xbf16, #tpu.memory_space<vmem>>, vector<3x16xbf16>,
    %86 = vector.extract_strided_slice %69 {offsets = [0, 4, 0], sizes = [3, 1, 16], strides = [1, 1, 1]} : vector<3x16x16xf32> to vector<3x1x16xf32>
    %87 = vector.shape_cast %86 : vector<3x1x16xf32> to vector<3x16xf32>
    %88 = arith.truncf %87 : vector<3x16xf32> to vector<3x16xbf16>
    %c0_28 = arith.constant 0 : index
    %c543 = arith.constant 543 : index
    %89 = vector.load %arg10[%c0_28, %c543] : memref<8x1024xbf16, #tpu.memory_space<vmem>>, vector<3x16xbf16>
    tpu.vector_store %arg10[%c0_28, %c543], %88 {strides = array<i32>} : memref<8x1024xbf16, #tpu.memory_space<vmem>>, vector<3x16xbf16>,
    %90 = vector.extract_strided_slice %69 {offsets = [0, 5, 0], sizes = [3, 1, 16], strides = [1, 1, 1]} : vector<3x16x16xf32> to vector<3x1x16xf32>
    %91 = vector.shape_cast %90 : vector<3x1x16xf32> to vector<3x16xf32>
    %92 = arith.truncf %91 : vector<3x16xf32> to vector<3x16xbf16>
    %c0_29 = arith.constant 0 : index
    %c561 = arith.constant 561 : index
    %93 = vector.load %arg10[%c0_29, %c561] : memref<8x1024xbf16, #tpu.memory_space<vmem>>, vector<3x16xbf16>
    tpu.vector_store %arg10[%c0_29, %c561], %92 {strides = array<i32>} : memref<8x1024xbf16, #tpu.memory_space<vmem>>, vector<3x16xbf16>,
    %94 = vector.extract_strided_slice %69 {offsets = [0, 6, 0], sizes = [3, 1, 16], strides = [1, 1, 1]} : vector<3x16x16xf32> to vector<3x1x16xf32>
    %95 = vector.shape_cast %94 : vector<3x1x16xf32> to vector<3x16xf32>
    %96 = arith.truncf %95 : vector<3x16xf32> to vector<3x16xbf16>
    %c0_30 = arith.constant 0 : index
    %c579 = arith.constant 579 : index
    %97 = vector.load %arg10[%c0_30, %c579] : memref<8x1024xbf16, #tpu.memory_space<vmem>>, vector<3x16xbf16>
    tpu.vector_store %arg10[%c0_30, %c579], %96 {strides = array<i32>} : memref<8x1024xbf16, #tpu.memory_space<vmem>>, vector<3x16xbf16>,
    %98 = vector.extract_strided_slice %69 {offsets = [0, 7, 0], sizes = [3, 1, 16], strides = [1, 1, 1]} : vector<3x16x16xf32> to vector<3x1x16xf32>
    %99 = vector.shape_cast %98 : vector<3x1x16xf32> to vector<3x16xf32>
    %100 = arith.truncf %99 : vector<3x16xf32> to vector<3x16xbf16>
    %c0_31 = arith.constant 0 : index
    %c597 = arith.constant 597 : index
    %101 = vector.load %arg10[%c0_31, %c597] : memref<8x1024xbf16, #tpu.memory_space<vmem>>, vector<3x16xbf16>
    tpu.vector_store %arg10[%c0_31, %c597], %100 {strides = array<i32>} : memref<8x1024xbf16, #tpu.memory_space<vmem>>, vector<3x16xbf16>,
    %102 = vector.extract_strided_slice %69 {offsets = [0, 8, 0], sizes = [3, 1, 16], strides = [1, 1, 1]} : vector<3x16x16xf32> to vector<3x1x16xf32>
    %103 = vector.shape_cast %102 : vector<3x1x16xf32> to vector<3x16xf32>
    %104 = arith.truncf %103 : vector<3x16xf32> to vector<3x16xbf16>
    %c0_32 = arith.constant 0 : index
    %c615 = arith.constant 615 : index
    %105 = vector.load %arg10[%c0_32, %c615] : memref<8x1024xbf16, #tpu.memory_space<vmem>>, vector<3x16xbf16>
    tpu.vector_store %arg10[%c0_32, %c615], %104 {strides = array<i32>} : memref<8x1024xbf16, #tpu.memory_space<vmem>>, vector<3x16xbf16>,
    %106 = vector.extract_strided_slice %69 {offsets = [0, 9, 0], sizes = [3, 1, 16], strides = [1, 1, 1]} : vector<3x16x16xf32> to vector<3x1x16xf32>
    %107 = vector.shape_cast %106 : vector<3x1x16xf32> to vector<3x16xf32>
    %108 = arith.truncf %107 : vector<3x16xf32> to vector<3x16xbf16>
    %c0_33 = arith.constant 0 : index
    %c633 = arith.constant 633 : index
    %109 = vector.load %arg10[%c0_33, %c633] : memref<8x1024xbf16, #tpu.memory_space<vmem>>, vector<3x16xbf16>
    tpu.vector_store %arg10[%c0_33, %c633], %108 {strides = array<i32>} : memref<8x1024xbf16, #tpu.memory_space<vmem>>, vector<3x16xbf16>,
    %110 = vector.extract_strided_slice %69 {offsets = [0, 10, 0], sizes = [3, 1, 16], strides = [1, 1, 1]} : vector<3x16x16xf32> to vector<3x1x16xf32>
    %111 = vector.shape_cast %110 : vector<3x1x16xf32> to vector<3x16xf32>
    %112 = arith.truncf %111 : vector<3x16xf32> to vector<3x16xbf16>
    %c0_34 = arith.constant 0 : index
    %c651 = arith.constant 651 : index
    %113 = vector.load %arg10[%c0_34, %c651] : memref<8x1024xbf16, #tpu.memory_space<vmem>>, vector<3x16xbf16>
    tpu.vector_store %arg10[%c0_34, %c651], %112 {strides = array<i32>} : memref<8x1024xbf16, #tpu.memory_space<vmem>>, vector<3x16xbf16>,
    %114 = vector.extract_strided_slice %69 {offsets = [0, 11, 0], sizes = [3, 1, 16], strides = [1, 1, 1]} : vector<3x16x16xf32> to vector<3x1x16xf32>
    %115 = vector.shape_cast %114 : vector<3x1x16xf32> to vector<3x16xf32>
    %116 = arith.truncf %115 : vector<3x16xf32> to vector<3x16xbf16>
    %c0_35 = arith.constant 0 : index
    %c669 = arith.constant 669 : index
    %117 = vector.load %arg10[%c0_35, %c669] : memref<8x1024xbf16, #tpu.memory_space<vmem>>, vector<3x16xbf16>
    tpu.vector_store %arg10[%c0_35, %c669], %116 {strides = array<i32>} : memref<8x1024xbf16, #tpu.memory_space<vmem>>, vector<3x16xbf16>,
    %118 = vector.extract_strided_slice %69 {offsets = [0, 12, 0], sizes = [3, 1, 16], strides = [1, 1, 1]} : vector<3x16x16xf32> to vector<3x1x16xf32>
    %119 = vector.shape_cast %118 : vector<3x1x16xf32> to vector<3x16xf32>
    %120 = arith.truncf %119 : vector<3x16xf32> to vector<3x16xbf16>
    %c0_36 = arith.constant 0 : index
    %c687 = arith.constant 687 : index
    %121 = vector.load %arg10[%c0_36, %c687] : memref<8x1024xbf16, #tpu.memory_space<vmem>>, vector<3x16xbf16>
    tpu.vector_store %arg10[%c0_36, %c687], %120 {strides = array<i32>} : memref<8x1024xbf16, #tpu.memory_space<vmem>>, vector<3x16xbf16>,
    %122 = vector.extract_strided_slice %69 {offsets = [0, 13, 0], sizes = [3, 1, 16], strides = [1, 1, 1]} : vector<3x16x16xf32> to vector<3x1x16xf32>
    %123 = vector.shape_cast %122 : vector<3x1x16xf32> to vector<3x16xf32>
    %124 = arith.truncf %123 : vector<3x16xf32> to vector<3x16xbf16>
    %c0_37 = arith.constant 0 : index
    %c705 = arith.constant 705 : index
    %125 = vector.load %arg10[%c0_37, %c705] : memref<8x1024xbf16, #tpu.memory_space<vmem>>, vector<3x16xbf16>
    tpu.vector_store %arg10[%c0_37, %c705], %124 {strides = array<i32>} : memref<8x1024xbf16, #tpu.memory_space<vmem>>, vector<3x16xbf16>,
    %126 = vector.extract_strided_slice %69 {offsets = [0, 14, 0], sizes = [3, 1, 16], strides = [1, 1, 1]} : vector<3x16x16xf32> to vector<3x1x16xf32>
    %127 = vector.shape_cast %126 : vector<3x1x16xf32> to vector<3x16xf32>
    %128 = arith.truncf %127 : vector<3x16xf32> to vector<3x16xbf16>
    %c0_38 = arith.constant 0 : index
    %c723 = arith.constant 723 : index
    %129 = vector.load %arg10[%c0_38, %c723] : memref<8x1024xbf16, #tpu.memory_space<vmem>>, vector<3x16xbf16>
    tpu.vector_store %arg10[%c0_38, %c723], %128 {strides = array<i32>} : memref<8x1024xbf16, #tpu.memory_space<vmem>>, vector<3x16xbf16>,
    %130 = vector.extract_strided_slice %69 {offsets = [0, 15, 0], sizes = [3, 1, 16], strides = [1, 1, 1]} : vector<3x16x16xf32> to vector<3x1x16xf32>
    %131 = vector.shape_cast %130 : vector<3x1x16xf32> to vector<3x16xf32>
    %132 = arith.truncf %131 : vector<3x16xf32> to vector<3x16xbf16>
    %c0_39 = arith.constant 0 : index
    %c741 = arith.constant 741 : index
    %133 = vector.load %arg10[%c0_39, %c741] : memref<8x1024xbf16, #tpu.memory_space<vmem>>, vector<3x16xbf16>
    tpu.vector_store %arg10[%c0_39, %c741], %132 {strides = array<i32>} : memref<8x1024xbf16, #tpu.memory_space<vmem>>, vector<3x16xbf16>,
    %c0_40 = arith.constant 0 : index
    %c109 = arith.constant 109 : index
    %134 = vector.load %arg10[%c0_40, %c109] : memref<8x1024xbf16, #tpu.memory_space<vmem>>, vector<8x768xbf16>
    %c0_41 = arith.constant 0 : index
    %c0_42 = arith.constant 0 : index
    %135 = vector.load %arg11[%c0_41, %c0_42] : memref<72x768xbf16, #tpu.memory_space<vmem>>, vector<8x768xbf16>
    tpu.vector_store %arg11[%c0_41, %c0_42], %134 {strides = array<i32>} : memref<72x768xbf16, #tpu.memory_space<vmem>>, vector<8x768xbf16>,
    %c0_43 = arith.constant 0 : index
    %c110 = arith.constant 110 : index
    %136 = vector.load %arg10[%c0_43, %c110] : memref<8x1024xbf16, #tpu.memory_space<vmem>>, vector<8x768xbf16>
    %c8 = arith.constant 8 : index
    %c0_44 = arith.constant 0 : index
    %137 = vector.load %arg11[%c8, %c0_44] : memref<72x768xbf16, #tpu.memory_space<vmem>>, vector<8x768xbf16>
    tpu.vector_store %arg11[%c8, %c0_44], %136 {strides = array<i32>} : memref<72x768xbf16, #tpu.memory_space<vmem>>, vector<8x768xbf16>,
    %c0_45 = arith.constant 0 : index
    %c111 = arith.constant 111 : index
    %138 = vector.load %arg10[%c0_45, %c111] : memref<8x1024xbf16, #tpu.memory_space<vmem>>, vector<8x768xbf16>
    %c16 = arith.constant 16 : index
    %c0_46 = arith.constant 0 : index
    %139 = vector.load %arg11[%c16, %c0_46] : memref<72x768xbf16, #tpu.memory_space<vmem>>, vector<8x768xbf16>
    tpu.vector_store %arg11[%c16, %c0_46], %138 {strides = array<i32>} : memref<72x768xbf16, #tpu.memory_space<vmem>>, vector<8x768xbf16>,
    %c0_47 = arith.constant 0 : index
    %c127 = arith.constant 127 : index
    %140 = vector.load %arg10[%c0_47, %c127] : memref<8x1024xbf16, #tpu.memory_space<vmem>>, vector<8x768xbf16>
    %c24 = arith.constant 24 : index
    %c0_48 = arith.constant 0 : index
    %141 = vector.load %arg11[%c24, %c0_48] : memref<72x768xbf16, #tpu.memory_space<vmem>>, vector<8x768xbf16>
    tpu.vector_store %arg11[%c24, %c0_48], %140 {strides = array<i32>} : memref<72x768xbf16, #tpu.memory_space<vmem>>, vector<8x768xbf16>,
    %c0_49 = arith.constant 0 : index
    %c128 = arith.constant 128 : index
    %142 = vector.load %arg10[%c0_49, %c128] : memref<8x1024xbf16, #tpu.memory_space<vmem>>, vector<8x768xbf16>
    %c32 = arith.constant 32 : index
    %c0_50 = arith.constant 0 : index
    %143 = vector.load %arg11[%c32, %c0_50] : memref<72x768xbf16, #tpu.memory_space<vmem>>, vector<8x768xbf16>
    tpu.vector_store %arg11[%c32, %c0_50], %142 {strides = array<i32>} : memref<72x768xbf16, #tpu.memory_space<vmem>>, vector<8x768xbf16>,
    %c0_51 = arith.constant 0 : index
    %c129 = arith.constant 129 : index
    %144 = vector.load %arg10[%c0_51, %c129] : memref<8x1024xbf16, #tpu.memory_space<vmem>>, vector<8x768xbf16>
    %c40 = arith.constant 40 : index
    %c0_52 = arith.constant 0 : index
    %145 = vector.load %arg11[%c40, %c0_52] : memref<72x768xbf16, #tpu.memory_space<vmem>>, vector<8x768xbf16>
    tpu.vector_store %arg11[%c40, %c0_52], %144 {strides = array<i32>} : memref<72x768xbf16, #tpu.memory_space<vmem>>, vector<8x768xbf16>,
    %c0_53 = arith.constant 0 : index
    %c145 = arith.constant 145 : index
    %146 = vector.load %arg10[%c0_53, %c145] : memref<8x1024xbf16, #tpu.memory_space<vmem>>, vector<8x768xbf16>
    %c48 = arith.constant 48 : index
    %c0_54 = arith.constant 0 : index
    %147 = vector.load %arg11[%c48, %c0_54] : memref<72x768xbf16, #tpu.memory_space<vmem>>, vector<8x768xbf16>
    tpu.vector_store %arg11[%c48, %c0_54], %146 {strides = array<i32>} : memref<72x768xbf16, #tpu.memory_space<vmem>>, vector<8x768xbf16>,
    %c0_55 = arith.constant 0 : index
    %c146 = arith.constant 146 : index
    %148 = vector.load %arg10[%c0_55, %c146] : memref<8x1024xbf16, #tpu.memory_space<vmem>>, vector<8x768xbf16>
    %c56 = arith.constant 56 : index
    %c0_56 = arith.constant 0 : index
    %149 = vector.load %arg11[%c56, %c0_56] : memref<72x768xbf16, #tpu.memory_space<vmem>>, vector<8x768xbf16>
    tpu.vector_store %arg11[%c56, %c0_56], %148 {strides = array<i32>} : memref<72x768xbf16, #tpu.memory_space<vmem>>, vector<8x768xbf16>,
    %c0_57 = arith.constant 0 : index
    %c147_58 = arith.constant 147 : index
    %150 = vector.load %arg10[%c0_57, %c147_58] : memref<8x1024xbf16, #tpu.memory_space<vmem>>, vector<8x768xbf16>
    %c64 = arith.constant 64 : index
    %c0_59 = arith.constant 0 : index
    %151 = vector.load %arg11[%c64, %c0_59] : memref<72x768xbf16, #tpu.memory_space<vmem>>, vector<8x768xbf16>
    tpu.vector_store %arg11[%c64, %c0_59], %150 {strides = array<i32>} : memref<72x768xbf16, #tpu.memory_space<vmem>>, vector<8x768xbf16>,
    %c0_60 = arith.constant 0 : index
    %c0_61 = arith.constant 0 : index
    %152 = vector.load %arg1[%c0_60, %c0_61] : memref<8x72xbf16, #tpu.memory_space<vmem>>, vector<8x72xbf16>
    %c0_62 = arith.constant 0 : index
    %c0_63 = arith.constant 0 : index
    %153 = vector.load %arg11[%c0_62, %c0_63] : memref<72x768xbf16, #tpu.memory_space<vmem>>, vector<72x768xbf16>
    %cst_64 = arith.constant dense<0.000000e+00> : vector<8x768xf32>
    %154 = tpu.matmul %152, %153, %cst_64 {dimension_numbers = #tpu.dot_dimension_numbers<[1], [0], [0], [1], [0, 0, 1, 1], [], []>} : vector<8x72xbf16>, vector<72x768xbf16>, vector<8x768xf32> -> vector<8x768xf32>
    %c0_65 = arith.constant 0 : index
    %c0_66 = arith.constant 0 : index
    %155 = vector.load %arg2[%c0_65, %c0_66] : memref<8x1xf32, #tpu.memory_space<vmem>>, vector<8x1xf32>
    %156 = vector.broadcast %155 : vector<8x1xf32> to vector<8x768xf32>
    %157 = arith.addf %154, %156 : vector<8x768xf32>
    %cst_67 = arith.constant 0.000000e+00 : f32
    %158 = vector.broadcast %cst_67 : f32 to vector<8x768xf32>
    %159 = arith.maximumf %157, %158 : vector<8x768xf32>
    %c0_68 = arith.constant 0 : index
    %c0_69 = arith.constant 0 : index
    %160 = vector.load %arg5[%c0_68, %c0_69] : memref<1x768xf32, #tpu.memory_space<vmem>>, vector<1x768xf32>
    %161 = vector.broadcast %160 : vector<1x768xf32> to vector<8x768xf32>
    %162 = arith.mulf %159, %161 : vector<8x768xf32>
    %cst_70 = arith.constant 0.000000e+00 : bf16
    %163 = vector.broadcast %cst_70 : bf16 to vector<8x128xbf16>
    %c0_71 = arith.constant 0 : index
    %c0_72 = arith.constant 0 : index
    %164 = vector.load %arg12[%c0_71, %c0_72] : memref<8x1024xbf16, #tpu.memory_space<vmem>>, vector<8x128xbf16>
    tpu.vector_store %arg12[%c0_71, %c0_72], %163 {strides = array<i32>} : memref<8x1024xbf16, #tpu.memory_space<vmem>>, vector<8x128xbf16>,
    %cst_73 = arith.constant 0.000000e+00 : bf16
    %165 = vector.broadcast %cst_73 : bf16 to vector<8x128xbf16>
    %c0_74 = arith.constant 0 : index
    %c896 = arith.constant 896 : index
    %166 = vector.load %arg12[%c0_74, %c896] : memref<8x1024xbf16, #tpu.memory_space<vmem>>, vector<8x128xbf16>
    tpu.vector_store %arg12[%c0_74, %c896], %165 {strides = array<i32>} : memref<8x1024xbf16, #tpu.memory_space<vmem>>, vector<8x128xbf16>,
    %167 = arith.truncf %162 : vector<8x768xf32> to vector<8x768xbf16>
    %c0_75 = arith.constant 0 : index
    %c128_76 = arith.constant 128 : index
    %168 = vector.load %arg12[%c0_75, %c128_76] : memref<8x1024xbf16, #tpu.memory_space<vmem>>, vector<8x768xbf16>
    tpu.vector_store %arg12[%c0_75, %c128_76], %167 {strides = array<i32>} : memref<8x1024xbf16, #tpu.memory_space<vmem>>, vector<8x768xbf16>,
    %c0_77 = arith.constant 0 : index
    %c109_78 = arith.constant 109 : index
    %169 = vector.load %arg12[%c0_77, %c109_78] : memref<8x1024xbf16, #tpu.memory_space<vmem>>, vector<8x768xbf16>
    %c0_79 = arith.constant 0 : index
    %c0_80 = arith.constant 0 : index
    %170 = vector.load %arg13[%c0_79, %c0_80] : memref<72x768xbf16, #tpu.memory_space<vmem>>, vector<8x768xbf16>
    tpu.vector_store %arg13[%c0_79, %c0_80], %169 {strides = array<i32>} : memref<72x768xbf16, #tpu.memory_space<vmem>>, vector<8x768xbf16>,
    %c0_81 = arith.constant 0 : index
    %c110_82 = arith.constant 110 : index
    %171 = vector.load %arg12[%c0_81, %c110_82] : memref<8x1024xbf16, #tpu.memory_space<vmem>>, vector<8x768xbf16>
    %c8_83 = arith.constant 8 : index
    %c0_84 = arith.constant 0 : index
    %172 = vector.load %arg13[%c8_83, %c0_84] : memref<72x768xbf16, #tpu.memory_space<vmem>>, vector<8x768xbf16>
    tpu.vector_store %arg13[%c8_83, %c0_84], %171 {strides = array<i32>} : memref<72x768xbf16, #tpu.memory_space<vmem>>, vector<8x768xbf16>,
    %c0_85 = arith.constant 0 : index
    %c111_86 = arith.constant 111 : index
    %173 = vector.load %arg12[%c0_85, %c111_86] : memref<8x1024xbf16, #tpu.memory_space<vmem>>, vector<8x768xbf16>
    %c16_87 = arith.constant 16 : index
    %c0_88 = arith.constant 0 : index
    %174 = vector.load %arg13[%c16_87, %c0_88] : memref<72x768xbf16, #tpu.memory_space<vmem>>, vector<8x768xbf16>
    tpu.vector_store %arg13[%c16_87, %c0_88], %173 {strides = array<i32>} : memref<72x768xbf16, #tpu.memory_space<vmem>>, vector<8x768xbf16>,
    %c0_89 = arith.constant 0 : index
    %c127_90 = arith.constant 127 : index
    %175 = vector.load %arg12[%c0_89, %c127_90] : memref<8x1024xbf16, #tpu.memory_space<vmem>>, vector<8x768xbf16>
    %c24_91 = arith.constant 24 : index
    %c0_92 = arith.constant 0 : index
    %176 = vector.load %arg13[%c24_91, %c0_92] : memref<72x768xbf16, #tpu.memory_space<vmem>>, vector<8x768xbf16>
    tpu.vector_store %arg13[%c24_91, %c0_92], %175 {strides = array<i32>} : memref<72x768xbf16, #tpu.memory_space<vmem>>, vector<8x768xbf16>,
    %c0_93 = arith.constant 0 : index
    %c128_94 = arith.constant 128 : index
    %177 = vector.load %arg12[%c0_93, %c128_94] : memref<8x1024xbf16, #tpu.memory_space<vmem>>, vector<8x768xbf16>
    %c32_95 = arith.constant 32 : index
    %c0_96 = arith.constant 0 : index
    %178 = vector.load %arg13[%c32_95, %c0_96] : memref<72x768xbf16, #tpu.memory_space<vmem>>, vector<8x768xbf16>
    tpu.vector_store %arg13[%c32_95, %c0_96], %177 {strides = array<i32>} : memref<72x768xbf16, #tpu.memory_space<vmem>>, vector<8x768xbf16>,
    %c0_97 = arith.constant 0 : index
    %c129_98 = arith.constant 129 : index
    %179 = vector.load %arg12[%c0_97, %c129_98] : memref<8x1024xbf16, #tpu.memory_space<vmem>>, vector<8x768xbf16>
    %c40_99 = arith.constant 40 : index
    %c0_100 = arith.constant 0 : index
    %180 = vector.load %arg13[%c40_99, %c0_100] : memref<72x768xbf16, #tpu.memory_space<vmem>>, vector<8x768xbf16>
    tpu.vector_store %arg13[%c40_99, %c0_100], %179 {strides = array<i32>} : memref<72x768xbf16, #tpu.memory_space<vmem>>, vector<8x768xbf16>,
    %c0_101 = arith.constant 0 : index
    %c145_102 = arith.constant 145 : index
    %181 = vector.load %arg12[%c0_101, %c145_102] : memref<8x1024xbf16, #tpu.memory_space<vmem>>, vector<8x768xbf16>
    %c48_103 = arith.constant 48 : index
    %c0_104 = arith.constant 0 : index
    %182 = vector.load %arg13[%c48_103, %c0_104] : memref<72x768xbf16, #tpu.memory_space<vmem>>, vector<8x768xbf16>
    tpu.vector_store %arg13[%c48_103, %c0_104], %181 {strides = array<i32>} : memref<72x768xbf16, #tpu.memory_space<vmem>>, vector<8x768xbf16>,
    %c0_105 = arith.constant 0 : index
    %c146_106 = arith.constant 146 : index
    %183 = vector.load %arg12[%c0_105, %c146_106] : memref<8x1024xbf16, #tpu.memory_space<vmem>>, vector<8x768xbf16>
    %c56_107 = arith.constant 56 : index
    %c0_108 = arith.constant 0 : index
    %184 = vector.load %arg13[%c56_107, %c0_108] : memref<72x768xbf16, #tpu.memory_space<vmem>>, vector<8x768xbf16>
    tpu.vector_store %arg13[%c56_107, %c0_108], %183 {strides = array<i32>} : memref<72x768xbf16, #tpu.memory_space<vmem>>, vector<8x768xbf16>,
    %c0_109 = arith.constant 0 : index
    %c147_110 = arith.constant 147 : index
    %185 = vector.load %arg12[%c0_109, %c147_110] : memref<8x1024xbf16, #tpu.memory_space<vmem>>, vector<8x768xbf16>
    %c64_111 = arith.constant 64 : index
    %c0_112 = arith.constant 0 : index
    %186 = vector.load %arg13[%c64_111, %c0_112] : memref<72x768xbf16, #tpu.memory_space<vmem>>, vector<8x768xbf16>
    tpu.vector_store %arg13[%c64_111, %c0_112], %185 {strides = array<i32>} : memref<72x768xbf16, #tpu.memory_space<vmem>>, vector<8x768xbf16>,
    %c0_113 = arith.constant 0 : index
    %c0_114 = arith.constant 0 : index
    %187 = vector.load %arg3[%c0_113, %c0_114] : memref<16x72xbf16, #tpu.memory_space<vmem>>, vector<16x72xbf16>
    %c0_115 = arith.constant 0 : index
    %c0_116 = arith.constant 0 : index
    %188 = vector.load %arg13[%c0_115, %c0_116] : memref<72x768xbf16, #tpu.memory_space<vmem>>, vector<72x768xbf16>
    %cst_117 = arith.constant dense<0.000000e+00> : vector<16x768xf32>
    %189 = tpu.matmul %187, %188, %cst_117 {dimension_numbers = #tpu.dot_dimension_numbers<[1], [0], [0], [1], [0, 0, 1, 1], [], []>} : vector<16x72xbf16>, vector<72x768xbf16>, vector<16x768xf32> -> vector<16x768xf32>
    %c0_118 = arith.constant 0 : index
    %c0_119 = arith.constant 0 : index
    %190 = vector.load %arg4[%c0_118, %c0_119] : memref<16x1xf32, #tpu.memory_space<vmem>>, vector<16x1xf32>
    %191 = vector.broadcast %190 : vector<16x1xf32> to vector<16x768xf32>
    %192 = arith.addf %189, %191 : vector<16x768xf32>
    %cst_120 = arith.constant 0.000000e+00 : f32
    %193 = vector.broadcast %cst_120 : f32 to vector<16x768xf32>
    %194 = arith.maximumf %192, %193 : vector<16x768xf32>
    %195 = arith.truncf %194 : vector<16x768xf32> to vector<16x768xbf16>
    %c0_121 = arith.constant 0 : index
    %c0_122 = arith.constant 0 : index
    %196 = vector.load %arg6[%c0_121, %c0_122] : memref<2x768xbf16, #tpu.memory_space<vmem>>, vector<2x768xbf16>
    %cst_123 = arith.constant dense<0.000000e+00> : vector<16x2xf32>
    %197 = tpu.matmul %195, %196, %cst_123 {dimension_numbers = #tpu.dot_dimension_numbers<[1], [1], [0], [0], [0, 0, 1, 0], [], []>} : vector<16x768xbf16>, vector<2x768xbf16>, vector<16x2xf32> -> vector<16x2xf32>
    %c0_124 = arith.constant 0 : index
    %c0_125 = arith.constant 0 : index
    %198 = vector.load %arg7[%c0_124, %c0_125] : memref<16x10xf32, #tpu.memory_space<vmem>>, vector<16x10xf32>
    %cst_126 = arith.constant dense<0.000000e+00> : vector<2x10xf32>
    %199 = tpu.matmul %197, %198, %cst_126 {dimension_numbers = #tpu.dot_dimension_numbers<[0], [0], [1], [1], [0, 1, 1, 1], [], []>} : vector<16x2xf32>, vector<16x10xf32>, vector<2x10xf32> -> vector<2x10xf32>
    %c0_127 = arith.constant 0 : index
    %c0_128 = arith.constant 0 : index
    %200 = vector.load %arg8[%c0_127, %c0_128] : memref<1x10xf32, #tpu.memory_space<vmem>>, vector<1x10xf32>
    %201 = vector.broadcast %200 : vector<1x10xf32> to vector<2x10xf32>
    %202 = arith.addf %199, %201 : vector<2x10xf32>
    %c0_129 = arith.constant 0 : index
    %c0_130 = arith.constant 0 : index
    %203 = vector.load %arg9[%c0_129, %c0_130] : memref<2x10xf32, #tpu.memory_space<vmem>>, vector<2x10xf32>
    tpu.vector_store %arg9[%c0_129, %c0_130], %202 {strides = array<i32>} : memref<2x10xf32, #tpu.memory_space<vmem>>, vector<2x10xf32>,
    return
  }
}

</mosaic_0001>

<bundles_post_ra>
// kernel: master_analyzer_forward.1
= control target key start
LH: loop header
LB: loop body
LE: loop exit
PB: predicated region body
PF: predicated region fallthrough
CT: control target
= control target key end

     0   :  { %14 = vsyncpa [#allocation7], 0  ;;  %s3113_s0 = inlined_call_operand.hbm [shape: f32[2,3,16,16], index: 0, kind: input, shape index: {}]   ;;  %s3114_s1 = inlined_call_operand.vmem [shape: bf16[8,72], index: 1, kind: input, shape index: {}]   ;;  %s3115_s2 = inlined_call_operand.vmem [shape: f32[8,1], index: 2, kind: input, shape index: {}]   ;;  %s3116_s3 = inlined_call_operand.vmem [shape: bf16[16,72], index: 3, kind: input, shape index: {}]   ;;  %s3117_s4 = inlined_call_operand.vmem [shape: f32[16,1], index: 4, kind: input, shape index: {}]   ;;  %s3118_s5 = inlined_call_operand.vmem [shape: f32[1,768], index: 5, kind: input, shape index: {}]   ;;  %s3119_s6 = inlined_call_operand.vmem [shape: bf16[2,768], index: 6, kind: input, shape index: {}]   ;;  %s3120_s7 = inlined_call_operand.vmem [shape: f32[16,10], index: 7, kind: input, shape index: {}]   ;;  %s3121_s8 = inlined_call_operand.vmem [shape: f32[1,10], index: 8, kind: input, shape index: {}]   ;;  %s3122_s9 = inlined_call_operand.hbm [shape: f32[2,10], index: 9, kind: output, shape index: {}]  }
   0x1   :  { %15 = vsyncpa [#allocation8], 0  ;;  %s2390_s30 = smov [#allocation6]   ;;  %s2342_s13 = scalar_lea.hbm %s3113_s0, 1536 }
   0x2   :  { %s21_s10 = sshll.u32 %s2390_s30, 4  ;;  %p2343_p0 = scmp.ne.s32.totalorder %s3113_s0, %s2342_s13  ;;  %s22_s10 = int_to_ptr.vmem [resolvable:$true] %s21_s10 }
   0x3   :  { %p2346_p1 = scmp.lt.u32.totalorder %s2342_s13, %s3113_s0 }
   0x5   :  { %p2348_p2 = pnand %p2346_p1, %p2343_p0 }
   0x7   :  { %2351 = shalt.err (!%p2348_p2)
}
   0x8   :  { %s2352_s18 = scalar_lea.vmem %s22_s10, 1536  ;;  %p2357_p4 = scmp.lt.s32.totalorder %s22_s10, %s22_s10 }
   0x9   :  { %p2353_p3 = scmp.ne.s32.totalorder %s22_s10, %s2352_s18  ;;  %p2358_p5 = scmp.lt.s32.totalorder %s2352_s18, %s2352_s18 }
   0xb   :  { %p2359_p6 = por %p2358_p5, %p2357_p4 }
   0xd   :  { %p2360_p7 = pnand %p2359_p6, %p2353_p3 }
   0xf   :  { %2363 = shalt.err (!%p2360_p7)
}
  0x10   :  { %s2391_s19 = smov 128   ;;  %s2392_s20 = smov 8  }
  0x11   :  { %27 = dma.hbm_to_vmem [thread:$0]  %s3113_s0, 1536, %s22_s10, [#allocation7], %s2391_s19, %s2391_s19, %s2392_s20  }
  0x12   :  { %2386 = dma.done.wait [#allocation7], 1536  }
  0x13   :  { %2387 = vsyncadd [#allocation7], 4294965760  ;;  %v2393_v0 = vmov 0   ;;  %v52_v1 = vld [vmem:[#allocation6] sm:$0xff]  ;;  %v54_v2 = vld [vmem:[#allocation6 + $0x10] sm:$0xff]  ;;  %vm74_vm0 = vcmask 1041409  }
  0x14   :  { %48 = vst [vmem:[#allocation2] sm:$0xff] %v2393_v0  ;;  %49 = vst [vmem:[#allocation2 + $0x8] sm:$0xff] %v2393_v0  ;;  %1083 = vmatprep.mubr.bf16.mxu0 %v2393_v0  ;;  %1124 = vmatprep.mubr.bf16.mxu1 %v2393_v0  ;;  %v56_v3 = vld [vmem:[#allocation6 + $0x20] sm:$0xff]  ;;  %v2258_v4 = vpack.c.bf16 %v52_v1, %v52_v1  ;;  %v2259_v5 = vpack.c.bf16 %v54_v2, %v54_v2  ;;  %v53_v7 = vld [vmem:[#allocation6 + $0x8] sm:$0xff]  ;;  %vm77_vm1 = vcmask 1042434   ;;  %s2394_s0 = smov 19  }
  0x15   :  { %50 = vst [vmem:[#allocation2 + $0x10] sm:$0xff] %v2393_v0  ;;  %51 = vst [vmem:[#allocation2 + $0x18] sm:$0xff] %v2393_v0  ;;  %2337 = vset.pattern.permute.xlu0 %v2393_v0  ;;  %2338 = vset.pattern.permute.xlu1 %v2393_v0  ;;  %v2260_v6 = vpack.c.bf16 %v56_v3, %v56_v3  ;;  %v55_v8 = vld [vmem:[#allocation6 + $0x18] sm:$0xff]  ;;  %v57_v9 = vld [vmem:[#allocation6 + $0x28] sm:$0xff]  ;;  %v2261_v10 = vpack.c.bf16 %v53_v7, %v53_v7  ;;  %s2395_s23 = smov 55   ;;  %s2396_s24 = smov 37  }
  0x16   :  { %1218 = vst [vmem:[#allocation4] sm:$0xf] %v2393_v0  ;;  %1219 = vst [vmem:[#allocation4 + $0x1c] sm:$0xf] %v2393_v0  ;;  %v2262_v11 = vpack.c.bf16 %v55_v8, %v55_v8  ;;  %v2263_v12 = vpack.c.bf16 %v57_v9, %v57_v9  ;;  %v70_v13 = vunpack.c.l.b16 %v2258_v4  ;;  %v71_v14 = vunpack.c.l.b16 %v2259_v5  ;;  %s2397_s25 = smov 73   ;;  %s2398_s26 = smov 91  }
  0x17   :  { %v72_v15 = vunpack.c.l.b16 %v2260_v6  ;;  %v2497_v16 = vunpack.c.l.b16 %v2261_v10  ;;  %s2399_s27 = smov 109   ;;  %s2400_s28 = smov 127   ;;  %vm83_vm2 = vcmask 279704   ;;  %vm84_vm3 = vsmask.f32 1280 }
  0x18   :  { %v2499_v17 = vunpack.c.l.b16 %v2262_v11  ;;  %v2501_v18 = vunpack.c.l.b16 %v2263_v12  ;;  %v73_v19 = vrot.slane %v71_v14, 7  ;;  %v89_v21 = vrot.slane %v70_v13, 1  ;;  %s2401_s29 = smov 17   ;;  %s2402_s30 = smov 35   ;;  %vm85_vm4 = vmand %vm83_vm2, %vm84_vm3 }
  0x19   :  { %v76_v20 = vrot.slane %v72_v15, 6  ;;  %v91_v22 = vrot.slane %v72_v15, 7  ;;  %v102_v23 = vrot.slane %v70_v13, 2  ;;  %v103_v24 = vrot.slane %v71_v14, 1  ;;  %s2403_s10 = smov 53   ;;  %s2404_s11 = smov 71  }
  0x1a   :  { %v115_v25 = vrot.slane %v70_v13, 3  ;;  %v116_v26 = vrot.slane %v71_v14, 2  ;;  %v75_v27 = vsel %vm74_vm0, %v73_v19, %v70_v13  ;;  %v90_v28 = vsel %vm74_vm0, %v71_v14, %v89_v21  ;;  %s2405_s12 = smov 89   ;;  %s2406_s13 = smov 107  }
  0x1b   :  { %v118_v29 = vrot.slane %v72_v15, 1  ;;  %v129_v30 = vrot.slane %v70_v13, 4  ;;  %v78_v31 = vsel %vm77_vm1, %v76_v20, %v75_v27  ;;  %v92_v32 = vsel %vm77_vm1, %v91_v22, %v90_v28  ;;  %s2407_s14 = smov 125   ;;  %s2408_s15 = smov 15  }
  0x1c   :  { %v104_v33 = vsel %vm74_vm0, %v103_v24, %v102_v23  ;;  %v117_v34 = vsel %vm74_vm0, %v116_v26, %v115_v25  ;;  %v79_v35 = vpack.c.b16 %v78_v31, %v78_v31  ;;  %v93_v36 = vpack.c.b16 %v92_v32, %v92_v32  ;;  %v323_v26 = vld [vmem:[#allocation6 + $0x30] sm:$0xff]  ;;  %v325_v31 = vld [vmem:[#allocation6 + $0x40] sm:$0xff]  ;;  %s2409_s16 = smov 33   ;;  %s2410_s17 = smov 87  }
  0x1d   :  { %v105_v37 = vsel %vm77_vm1, %v72_v15, %v104_v33  ;;  %v119_v38 = vsel %vm77_vm1, %v118_v29, %v117_v34  ;;  %v130_v41 = vrot.slane %v71_v14, 3  ;;  %v132_v42 = vrot.slane %v72_v15, 2  ;;  %v327_v32 = vld [vmem:[#allocation6 + $0x50] sm:$0xff]  ;;  %s2411_s18 = smov 105   ;;  %s2412_s19 = smov 123  }
  0x1e   :  { %v106_v39 = vpack.c.b16 %v105_v37, %v105_v37  ;;  %v120_v40 = vpack.c.b16 %v119_v38, %v119_v38  ;;  %80 = vrot.lane.b32.xlu0 %v79_v35, %s2394_s0  ;;  %v143_v43 = vrot.slane %v70_v13, 5  ;;  %v144_v44 = vrot.slane %v71_v14, 4  ;;  %s2413_s20 = smov 31   ;;  %s2414_s21 = smov 13  }
  0x1f   :  { %v146_v45 = vrot.slane %v72_v15, 3  ;;  %v157_v46 = vrot.slane %v70_v13, 6  ;;  %v131_v47 = vsel %vm74_vm0, %v130_v41, %v129_v30  ;;  %v158_v48 = vrot.slane %v71_v14, 5  ;;  %s2415_s22 = smov 67  }
  0x20   :  { %107 = vrot.lane.b32.xlu1 %v106_v39, %s2395_s23  ;;  %v160_v49 = vrot.slane %v72_v15, 4  ;;  %v178_v50 = vrot.slane %v70_v13, 7  ;;  %v133_v51 = vsel %vm77_vm1, %v132_v42, %v131_v47  ;;  %v145_v52 = vsel %vm74_vm0, %v144_v44, %v143_v43  ;;  %s2416_s23 = smov 103  }
  0x21   :  { %v179_v53 = vrot.slane %v71_v14, 6  ;;  %v181_v54 = vrot.slane %v72_v15, 5  ;;  %v147_v55 = vsel %vm77_vm1, %v146_v45, %v145_v52  ;;  %v159_v56 = vsel %vm74_vm0, %v158_v48, %v157_v46 }
  0x22   :  { %v207_v57 = vrot.slane %v2499_v17, 7  ;;  %94 = vrot.lane.b32.xlu0 %v93_v36, %s2396_s24  ;;  %v134_v58 = vpack.c.b16 %v133_v51, %v133_v51  ;;  %v161_v59 = vsel %vm77_vm1, %v160_v49, %v159_v56  ;;  %v209_v61 = vrot.slane %v2501_v18, 6  ;;  %s2417_s24 = smov 11  }
  0x23   :  { %v180_v60 = vsel %vm74_vm0, %v179_v53, %v178_v50  ;;  %v148_v62 = vpack.c.b16 %v147_v55, %v147_v55  ;;  %v220_v1 = vrot.slane %v2497_v16, 1  ;;  %v222_v2 = vrot.slane %v2501_v18, 7 }
  0x24   :  { %121 = vrot.lane.b32.xlu1 %v120_v40, %s2397_s25  ;;  %v182_v63 = vsel %vm77_vm1, %v181_v54, %v180_v60  ;;  %v208_v0 = vsel %vm74_vm0, %v207_v57, %v2497_v16  ;;  %v233_v3 = vrot.slane %v2497_v16, 2  ;;  %v162_v4 = vpack.c.b16 %v161_v59, %v161_v59  ;;  %v326_v60 = vld [vmem:[#allocation6 + $0x48] sm:$0xff]  ;;  %s2418_s25 = smov 47  }
  0x25   :  { %v221_v5 = vsel %vm74_vm0, %v2499_v17, %v220_v1  ;;  %v234_v6 = vrot.slane %v2499_v17, 1  ;;  %v246_v7 = vrot.slane %v2497_v16, 3  ;;  %v183_v8 = vpack.c.b16 %v182_v63, %v182_v63 }
  0x26   :  { %135 = vrot.lane.b32.xlu0 %v134_v58, %s2398_s26  ;;  %v210_v9 = vsel %vm77_vm1, %v209_v61, %v208_v0  ;;  %v223_v10 = vsel %vm77_vm1, %v222_v2, %v221_v5  ;;  %v247_v11 = vrot.slane %v2499_v17, 2  ;;  %v249_v13 = vrot.slane %v2501_v18, 1  ;;  %s2419_s26 = smov 83  }
  0x27   :  { %v235_v12 = vsel %vm74_vm0, %v234_v6, %v233_v3  ;;  %v260_v14 = vrot.slane %v2497_v16, 4  ;;  %v261_v15 = vrot.slane %v2499_v17, 3  ;;  %v274_v20 = vrot.slane %v2497_v16, 5  ;;  %v324_v6 = vld [vmem:[#allocation6 + $0x38] sm:$0xff] }
  0x28   :  { %149 = vrot.lane.b32.xlu1 %v148_v62, %s2399_s27  ;;  %v248_v19 = vsel %vm74_vm0, %v247_v11, %v246_v7  ;;  %v275_v21 = vrot.slane %v2499_v17, 4  ;;  %v211_v22 = vpack.c.b16 %v210_v9, %v210_v9  ;;  %v224_v23 = vpack.c.b16 %v223_v10, %v223_v10 }
  0x29   :  { %v236_v24 = vsel %vm77_vm1, %v2501_v18, %v235_v12  ;;  %v263_v25 = vrot.slane %v2501_v18, 2  ;;  %v250_v27 = vsel %vm77_vm1, %v249_v13, %v248_v19  ;;  %v262_v28 = vsel %vm74_vm0, %v261_v15, %v260_v14 }
  0x2a   :  { %163 = vrot.lane.b32.xlu0 %v162_v4, %s2400_s28  ;;  %v276_v29 = vsel %vm74_vm0, %v275_v21, %v274_v20  ;;  %v277_v30 = vrot.slane %v2501_v18, 3  ;;  %v294_v33 = vrot.slane %v2497_v16, 6  ;;  %v295_v34 = vrot.slane %v2499_v17, 5  ;;  %v328_v4 = vld [vmem:[#allocation6 + $0x58] sm:$0xff] }
  0x2b   :  { %v308_v35 = vrot.slane %v2497_v16, 7  ;;  %v309_v36 = vrot.slane %v2499_v17, 6  ;;  %v237_v37 = vpack.c.b16 %v236_v24, %v236_v24  ;;  %v2264_v38 = vpack.c.bf16 %v323_v26, %v323_v26 }
  0x2c   :  { %184 = vrot.lane.b32.xlu1 %v183_v8, %s2401_s29  ;;  %v251_v39 = vpack.c.b16 %v250_v27, %v250_v27  ;;  %v264_v40 = vsel %vm77_vm1, %v263_v25, %v262_v28  ;;  %v2265_v41 = vpack.c.bf16 %v325_v31, %v325_v31  ;;  %v2266_v42 = vpack.c.bf16 %v327_v32, %v327_v32 }
  0x2d   :  { %v278_v43 = vsel %vm77_vm1, %v277_v30, %v276_v29  ;;  %v297_v44 = vrot.slane %v2501_v18, 4  ;;  %v311_v45 = vrot.slane %v2501_v18, 5  ;;  %v2559_v16 = vunpack.c.l.b16 %v2264_v38 }
  0x2e   :  { %212 = vrot.lane.b32.xlu0 %v211_v22, %s2402_s30  ;;  %v296_v17 = vsel %vm74_vm0, %v295_v34, %v294_v33  ;;  %v310_v46 = vsel %vm74_vm0, %v309_v36, %v308_v35  ;;  %v2563_v47 = vunpack.c.l.b16 %v2265_v41  ;;  %v2565_v48 = vunpack.c.l.b16 %v2266_v42  ;;  %s2420_s30 = smov 49  }
  0x2f   :  { %v357_v49 = vrot.slane %v2559_v16, 1  ;;  %v265_v50 = vpack.c.b16 %v264_v40, %v264_v40  ;;  %v279_v18 = vpack.c.b16 %v278_v43, %v278_v43  ;;  %v298_v52 = vsel %vm77_vm1, %v297_v44, %v296_v17 }
  0x30   :  { %225 = vrot.lane.b32.xlu1 %v224_v23, %s2403_s10  ;;  %v344_v51 = vrot.slane %v2563_v47, 7  ;;  %v312_v53 = vsel %vm77_vm1, %v311_v45, %v310_v46  ;;  %v346_v54 = vrot.slane %v2565_v48, 6  ;;  %v370_v56 = vrot.slane %v2559_v16, 2  ;;  %s2421_s10 = smov 85  }
  0x31   :  { %v371_v57 = vrot.slane %v2563_v47, 1  ;;  %v359_v58 = vrot.slane %v2565_v48, 7  ;;  %v358_v59 = vsel %vm74_vm0, %v2563_v47, %v357_v49  ;;  %v299_v61 = vpack.c.b16 %v298_v52, %v298_v52 }
  0x32   :  { %238 = vrot.lane.b32.xlu0 %v237_v37, %s2404_s11  ;;  %v345_v55 = vsel %vm74_vm0, %v344_v51, %v2559_v16  ;;  %v313_v62 = vpack.c.b16 %v312_v53, %v312_v53  ;;  %v403_v0 = vrot.slane %v2559_v16, 4  ;;  %v404_v2 = vrot.slane %v2563_v47, 3  ;;  %s2422_s11 = smov 121  }
  0x33   :  { %v347_v63 = vsel %vm77_vm1, %v346_v54, %v345_v55  ;;  %v372_v1 = vsel %vm74_vm0, %v371_v57, %v370_v56  ;;  %v360_v3 = vsel %vm77_vm1, %v359_v58, %v358_v59  ;;  %v2268_v5 = vpack.c.bf16 %v326_v60, %v326_v60 }
  0x34   :  { %252 = vrot.lane.b32.xlu1 %v251_v39, %s2405_s12  ;;  %v348_v7 = vpack.c.b16 %v347_v63, %v347_v63  ;;  %v406_v8 = vrot.slane %v2565_v48, 2  ;;  %v373_v9 = vsel %vm77_vm1, %v2565_v48, %v372_v1  ;;  %v361_v10 = vpack.c.b16 %v360_v3, %v360_v3  ;;  %v592_v63 = vld [vmem:[#allocation2 + $0x18] sm:$0xf]  ;;  %s2423_s12 = smov 29  }
  0x35   :  { %v431_v11 = vrot.slane %v2559_v16, 6  ;;  %v2269_v12 = vpack.c.bf16 %v328_v4, %v328_v4  ;;  %v405_v13 = vsel %vm74_vm0, %v404_v2, %v403_v0  ;;  %v432_v14 = vrot.slane %v2563_v47, 5 }
  0x36   :  { %266 = vrot.lane.b32.xlu0 %v265_v50, %s2406_s13  ;;  %v2267_v15 = vpack.c.bf16 %v324_v6, %v324_v6  ;;  %v2590_v19 = vunpack.c.l.b16 %v2268_v5  ;;  %v374_v20 = vpack.c.b16 %v373_v9, %v373_v9  ;;  %v407_v21 = vsel %vm77_vm1, %v406_v8, %v405_v13  ;;  %s2424_s13 = smov 65  }
  0x37   :  { %v434_v22 = vrot.slane %v2565_v48, 4  ;;  %v2594_v23 = vunpack.c.l.b16 %v2269_v12  ;;  %v433_v24 = vsel %vm74_vm0, %v432_v14, %v431_v11  ;;  %v408_v27 = vpack.c.b16 %v407_v21, %v407_v21  ;;  %v86_v12 = vld [vmem:[#allocation2 + $0x4] sm:$0x3] }
  0x38   :  { %280 = vrot.lane.b32.xlu1 %v279_v18, %s2407_s14  ;;  %v2597_v25 = vunpack.c.l.b16 %v2267_v15  ;;  %v474_v26 = vrot.slane %v2590_v19, 7  ;;  %v389_v30 = vrot.slane %v2559_v16, 3  ;;  %v390_v31 = vrot.slane %v2563_v47, 2  ;;  %s2425_s14 = smov 101  }
  0x39   :  { %v435_v28 = vsel %vm77_vm1, %v434_v22, %v433_v24  ;;  %v476_v29 = vrot.slane %v2594_v23, 6  ;;  %v507_v34 = vrot.slane %v2590_v19, 1  ;;  %v392_v35 = vrot.slane %v2565_v48, 1 }
  0x3a   :  { %300 = vrot.lane.b32.xlu0 %v299_v61, %s2408_s15  ;;  %v475_v32 = vsel %vm74_vm0, %v474_v26, %v2597_v25  ;;  %v506_v33 = vrot.slane %v2597_v25, 2  ;;  %v391_v36 = vsel %vm74_vm0, %v390_v31, %v389_v30  ;;  %v436_v37 = vpack.c.b16 %v435_v28, %v435_v28  ;;  %s2426_s15 = smov 18  }
  0x3b   :  { %v393_v38 = vsel %vm77_vm1, %v392_v35, %v391_v36  ;;  %v477_v39 = vsel %vm77_vm1, %v476_v29, %v475_v32  ;;  %v533_v42 = vrot.slane %v2597_v25, 4  ;;  %v534_v43 = vrot.slane %v2590_v19, 3 }
  0x3c   :  { %314 = vrot.lane.b32.xlu1 %v313_v62, %s2409_s16  ;;  %v394_v40 = vpack.c.b16 %v393_v38, %v393_v38  ;;  %v508_v41 = vsel %vm74_vm0, %v507_v34, %v506_v33  ;;  %v478_v44 = vpack.c.b16 %v477_v39, %v477_v39  ;;  %v536_v17 = vrot.slane %v2594_v23, 2  ;;  %s2427_s16 = smov 1  }
  0x3d   :  { %v509_v45 = vsel %vm77_vm1, %v2594_v23, %v508_v41  ;;  %v535_v46 = vsel %vm74_vm0, %v534_v43, %v533_v42  ;;  %v561_v49 = vrot.slane %v2597_v25, 6  ;;  %v562_v50 = vrot.slane %v2590_v19, 5 }
  0x3e   :  { %349 = vrot.lane.b32.xlu0 %v348_v7, %s2410_s17  ;;  %v510_v51 = vpack.c.b16 %v509_v45, %v509_v45  ;;  %v537_v18 = vsel %vm77_vm1, %v536_v17, %v535_v46  ;;  %v564_v52 = vrot.slane %v2594_v23, 4  ;;  %v417_v56 = vrot.slane %v2559_v16, 5  ;;  %v626_v45 = vld [vmem:[#allocation2 + $0x18] sm:$0xf]  ;;  %s2428_s17 = smov 111  }
  0x3f   :  { %v563_v53 = vsel %vm74_vm0, %v562_v50, %v561_v49  ;;  %v538_v54 = vpack.c.b16 %v537_v18, %v537_v18  ;;  %v418_v57 = vrot.slane %v2563_v47, 4  ;;  %v420_v59 = vrot.slane %v2565_v48, 3 }
  0x40   :  { %362 = vrot.lane.b32.xlu1 %v361_v10, %s2411_s18  ;;  %v565_v55 = vsel %vm77_vm1, %v564_v52, %v563_v53  ;;  %v445_v0 = vrot.slane %v2559_v16, 7  ;;  %v446_v1 = vrot.slane %v2563_v47, 6  ;;  %v448_v2 = vrot.slane %v2565_v48, 5  ;;  %s2429_s18 = smov 110  }
  0x41   :  { %v566_v58 = vpack.c.b16 %v565_v55, %v565_v55  ;;  %v419_v60 = vsel %vm74_vm0, %v418_v57, %v417_v56  ;;  %v487_v6 = vrot.slane %v2597_v25, 1  ;;  %v489_v7 = vrot.slane %v2594_v23, 7 }
  0x42   :  { %375 = vrot.lane.b32.xlu0 %v374_v20, %s2412_s19  ;;  %v421_v61 = vsel %vm77_vm1, %v420_v59, %v419_v60  ;;  %v447_v3 = vsel %vm74_vm0, %v446_v1, %v445_v0  ;;  %v519_v47 = vrot.slane %v2597_v25, 3  ;;  %v520_v48 = vrot.slane %v2590_v19, 2 }
  0x43   :  { %v422_v62 = vpack.c.b16 %v421_v61, %v421_v61  ;;  %v449_v4 = vsel %vm77_vm1, %v448_v2, %v447_v3  ;;  %v488_v8 = vsel %vm74_vm0, %v2590_v19, %v487_v6  ;;  %v522_v10 = vrot.slane %v2594_v23, 1 }
  0x44   :  { %395 = vrot.lane.b32.xlu1 %v394_v40, %s2414_s21  ;;  %v450_v5 = vpack.c.b16 %v449_v4, %v449_v4  ;;  %v490_v16 = vsel %vm77_vm1, %v489_v7, %v488_v8  ;;  %v521_v11 = vsel %vm74_vm0, %v520_v48, %v519_v47  ;;  %vm97_vm5 = vcmask 427304  }
  0x45   :  { %v491_v9 = vpack.c.b16 %v490_v16, %v490_v16  ;;  %v523_v13 = vsel %vm77_vm1, %v522_v10, %v521_v11  ;;  %vm98_vm6 = vmand %vm97_vm5, %vm84_vm3  ;;  %vm110_vm7 = vcmask 574904   ;;  %v547_v26 = vrot.slane %v2597_v25, 5 }
  0x46   :  { %409 = vrot.lane.b32.xlu0 %v408_v27, %s2413_s20  ;;  %v524_v14 = vpack.c.b16 %v523_v13, %v523_v13  ;;  %v548_v27 = vrot.slane %v2590_v19, 4  ;;  %v550_v28 = vrot.slane %v2594_v23, 3  ;;  %vm111_vm8 = vmand %vm110_vm7, %vm84_vm3  ;;  %vm124_vm9 = vcmask 722504  }
  0x47   :  { %vm125_vm10 = vmand %vm124_vm9, %vm84_vm3  ;;  %v576_v38 = vrot.slane %v2590_v19, 6  ;;  %v578_v39 = vrot.slane %v2594_v23, 5  ;;  %vm138_vm11 = vcmask 870104   ;;  %vm152_vm13 = vcmask 1017704  }
  0x48   :  { %423 = vrot.lane.b32.xlu1 %v422_v62, %s2420_s30  ;;  %v549_v29 = vsel %vm74_vm0, %v548_v27, %v547_v26  ;;  %vm139_vm12 = vmand %vm138_vm11, %vm84_vm3  ;;  %vm169_vm15 = vcmask 1042424   ;;  %vm166_vm5 = vcmask 1039360   ;;  %vm187_vm7 = vcmask 263304  }
  0x49   :  { %v551_v31 = vsel %vm77_vm1, %v550_v28, %v549_v29  ;;  %vm153_vm14 = vmand %vm152_vm13, %vm84_vm3  ;;  %vm215_vm9 = vcmask 410904   ;;  %vm228_vm11 = vcmask 558504   ;;  %vm241_vm13 = vcmask 706104  }
  0x4a   :  { %437 = vrot.lane.b32.xlu0 %v436_v37, %s2415_s22  ;;  %v552_v32 = vpack.c.b16 %v551_v31, %v551_v31  ;;  %v575_v37 = vrot.slane %v2597_v25, 7  ;;  %vm170_vm2 = vmand %vm169_vm15, %vm84_vm3  ;;  %vm255_vm15 = vcmask 853704  }
  0x4c   :  { %451 = vrot.lane.b32.xlu1 %v450_v5, %s2421_s10  ;;  %v577_v41 = vsel %vm74_vm0, %v576_v38, %v575_v37  ;;  %vm171_vm0 = vcmask 119812   ;;  %s2434_s10 = smov [#allocation9]  }
  0x4d   :  { %v579_v42 = vsel %vm77_vm1, %v578_v39, %v577_v41  ;;  %vm172_vm1 = vsmask.f32 5376 }
  0x4e   :  { %479 = vrot.lane.b32.xlu0 %v478_v44, %s2416_s23  ;;  %v580_v43 = vpack.c.b16 %v579_v42, %v579_v42 }
  0x50   :  { %492 = vrot.lane.b32.xlu1 %v491_v9, %s2422_s11  ;;  %s2159_s11 = sshll.u32 %s2434_s10, 4  ;;  %s2160_s11 = int_to_ptr.vmem [resolvable:$true] %s2159_s11 }
  0x51   :  { %p2369_p9 = scmp.lt.s32.totalorder %s2160_s11, %s2160_s11 }
  0x52   :  { %511 = vrot.lane.b32.xlu0 %v510_v51, %s2417_s24 }
  0x54   :  { %525 = vrot.lane.b32.xlu1 %v524_v14, %s2423_s12  ;;  %s2364_s12 = scalar_lea.vmem %s2160_s11, 32 }
  0x55   :  { %p2365_p8 = scmp.ne.s32.totalorder %s2160_s11, %s2364_s12  ;;  %p2370_p10 = scmp.lt.s32.totalorder %s2364_s12, %s2364_s12 }
  0x56   :  { %539 = vrot.lane.b32.xlu0 %v538_v54, %s2418_s25 }
  0x57   :  { %p2371_p11 = por %p2370_p10, %p2369_p9 }
  0x58   :  { %553 = vrot.lane.b32.xlu1 %v552_v32, %s2424_s13 }
  0x59   :  { %p2372_p12 = pnand %p2371_p11, %p2365_p8 }
  0x5a   :  { %567 = vrot.lane.b32.xlu0 %v566_v58, %s2419_s26 }
  0x5c   :  { %581 = vrot.lane.b32.xlu1 %v580_v43, %s2425_s14 }
  0x5e   :  { %603 = vrot.lane.b32.xlu0 %v592_v63, %s2394_s0 }
  0x60   :  { %637 = vrot.lane.b32.xlu1 %v626_v45, %s2426_s15 }
  0x90   :  { %v81_v15 = vpop.permute.xlu0 %80 }
  0x91   :  { %v87_v20 = vsel %vm85_vm4, %v81_v15, %v86_v12  ;;  %vm173_vm4 = vmand %vm171_vm0, %vm172_vm1 }
  0x92   :  { %88 = vst [vmem:[#allocation2 + $0x4] sm:$0x3] %v87_v20  ;;  %v108_v30 = vpop.permute.xlu1 %107  ;;  %vm256_vm0 = vmand %vm255_vm15, %vm84_vm3 }
  0x94   :  { %v95_v21 = vpop.permute.xlu0 %94 }
  0x96   :  { %v122_v35 = vpop.permute.xlu1 %121 }
  0x98   :  { %v136_v44 = vpop.permute.xlu0 %135 }
  0x99   :  { %v99_v22 = vld [vmem:[#allocation2 + $0x4] sm:$0x3] }
  0x9a   :  { %v100_v24 = vsel %vm98_vm6, %v95_v21, %v99_v22  ;;  %v150_v19 = vpop.permute.xlu1 %149  ;;  %vm174_vm6 = vmor %vm173_vm4, %vm170_vm2  ;;  %vm269_vm2 = vcmask 1001304  }
  0x9b   :  { %101 = vst [vmem:[#allocation2 + $0x4] sm:$0x3] %v100_v24  ;;  %vm270_vm4 = vmand %vm269_vm2, %vm84_vm3 }
  0x9c   :  { %v164_v49 = vpop.permute.xlu0 %163 }
  0x9d   :  { %v165_v50 = vrot.slane %v164_v49, 4 }
  0x9e   :  { %v185_v53 = vpop.permute.xlu1 %184 }
  0x9f   :  { %v167_v51 = vsel %vm166_vm5, %v165_v50, %v164_v49 }
  0xa0   :  { %v213_v57 = vpop.permute.xlu0 %212 }
  0xa2   :  { %v112_v33 = vld [vmem:[#allocation2 + $0x4] sm:$0x3]  ;;  %v226_v60 = vpop.permute.xlu1 %225 }
  0xa3   :  { %v113_v34 = vsel %vm111_vm8, %v108_v30, %v112_v33  ;;  %vm188_vm8 = vmand %vm187_vm7, %vm84_vm3  ;;  %vm288_vm7 = vcmask 103428  }
  0xa4   :  { %114 = vst [vmem:[#allocation2 + $0x4] sm:$0x3] %v113_v34  ;;  %v239_v63 = vpop.permute.xlu0 %238 }
  0xa6   :  { %v253_v2 = vpop.permute.xlu1 %252 }
  0xa8   :  { %v267_v5 = vpop.permute.xlu0 %266 }
  0xaa   :  { %v281_v8 = vpop.permute.xlu1 %280 }
  0xab   :  { %v126_v36 = vld [vmem:[#allocation2 + $0x4] sm:$0x3]  ;;  %v282_v16 = vrot.slane %v281_v8, 4 }
  0xac   :  { %v127_v40 = vsel %vm125_vm10, %v122_v35, %v126_v36  ;;  %vm216_vm10 = vmand %vm215_vm9, %vm84_vm3  ;;  %v301_v10 = vpop.permute.xlu0 %300 }
  0xad   :  { %128 = vst [vmem:[#allocation2 + $0x4] sm:$0x3] %v127_v40  ;;  %vm289_vm9 = vmand %vm288_vm7, %vm172_vm1  ;;  %vm381_vm7 = vcmask 1042392  }
  0xae   :  { %v315_v14 = vpop.permute.xlu1 %314 }
  0xb0   :  { %v350_v21 = vpop.permute.xlu0 %349 }
  0xb2   :  { %v363_v26 = vpop.permute.xlu1 %362 }
  0xb4   :  { %v140_v17 = vld [vmem:[#allocation2 + $0x4] sm:$0x3]  ;;  %v376_v29 = vpop.permute.xlu0 %375 }
  0xb5   :  { %v141_v25 = vsel %vm139_vm12, %v136_v44, %v140_v17  ;;  %vm229_vm12 = vmand %vm228_vm11, %vm84_vm3  ;;  %v377_v30 = vrot.slane %v376_v29, 4 }
  0xb6   :  { %142 = vst [vmem:[#allocation2 + $0x4] sm:$0x3] %v141_v25  ;;  %v396_v34 = vpop.permute.xlu1 %395 }
  0xb8   :  { %v410_v38 = vpop.permute.xlu0 %409 }
  0xba   :  { %v424_v41 = vpop.permute.xlu1 %423 }
  0xbc   :  { %v438_v44 = vpop.permute.xlu0 %437 }
  0xbd   :  { %v154_v23 = vld [vmem:[#allocation2 + $0x4] sm:$0x3] }
  0xbe   :  { %v155_v46 = vsel %vm153_vm14, %v150_v19, %v154_v23  ;;  %vm242_vm14 = vmand %vm241_vm13, %vm84_vm3  ;;  %v452_v25 = vpop.permute.xlu1 %451 }
  0xbf   :  { %156 = vst [vmem:[#allocation2 + $0x4] sm:$0x3] %v155_v46 }
  0xc0   :  { %v480_v46 = vpop.permute.xlu0 %479 }
  0xc6   :  { %v175_v18 = vld [vmem:[#allocation2 + $0x4] sm:$0x33] }
  0xc7   :  { %v176_v52 = vsel %vm174_vm6, %v167_v51, %v175_v18  ;;  %vm286_vm6 = vcmask 1042408   ;;  %v493_v51 = vpop.permute.xlu1 %492 }
  0xc8   :  { %177 = vst [vmem:[#allocation2 + $0x4] sm:$0x33] %v176_v52  ;;  %v494_v18 = vrot.slane %v493_v51, 4 }
  0xcf   :  { %v189_v54 = vld [vmem:[#allocation2 + $0x8] sm:$0x3]  ;;  %v589_v55 = vld [vmem:[#allocation2] sm:$0xff] }
  0xd0   :  { %v190_v56 = vsel %vm188_vm8, %v185_v53, %v189_v54  ;;  %597 = vrot.lane.b32.xlu0 %v589_v55, %s2394_s0  ;;  %vm287_vm8 = vmand %vm286_vm6, %vm84_vm3 }
  0xd1   :  { %191 = vst [vmem:[#allocation2 + $0x8] sm:$0x3] %v190_v56  ;;  %vm290_vm11 = vmor %vm289_vm9, %vm287_vm8  ;;  %vm383_vm8 = vcmask 87044  }
  0xd2   :  { %vm382_vm9 = vmand %vm381_vm7, %vm84_vm3 }
  0xd4   :  { %631 = vrot.lane.b32.xlu0 %v589_v55, %s2426_s15 }
  0xd8   :  { %v217_v58 = vld [vmem:[#allocation2 + $0x8] sm:$0x3]  ;;  %664 = vrot.lane.b32.xlu0 %v589_v55, %s2401_s29 }
  0xd9   :  { %v218_v59 = vsel %vm216_vm10, %v213_v57, %v217_v58  ;;  %vm283_vm10 = vcmask 1022976  }
  0xda   :  { %219 = vst [vmem:[#allocation2 + $0x8] sm:$0x3] %v218_v59  ;;  %v284_v9 = vsel %vm283_vm10, %v282_v16, %v281_v8  ;;  %vm384_vm10 = vmand %vm383_vm8, %vm172_vm1  ;;  %vm454_vm8 = vcmask 820904   ;;  %v526_v59 = vpop.permute.xlu1 %525 }
  0xdc   :  { %697 = vrot.lane.b32.xlu0 %v589_v55, %s2427_s16  ;;  %v512_v55 = vpop.permute.xlu0 %511 }
  0xe1   :  { %v230_v61 = vld [vmem:[#allocation2 + $0x8] sm:$0x3] }
  0xe2   :  { %v231_v62 = vsel %vm229_vm12, %v226_v60, %v230_v61  ;;  %vm303_vm12 = vcmask 246904  }
  0xe3   :  { %232 = vst [vmem:[#allocation2 + $0x8] sm:$0x3] %v231_v62  ;;  %vm304_vm13 = vmand %vm303_vm12, %vm84_vm3  ;;  %v540_v62 = vpop.permute.xlu0 %539 }
  0xe4   :  { %vm385_vm12 = vmor %vm384_vm10, %vm382_vm9  ;;  %vm482_vm10 = vcmask 968504  }
  0xe5   :  { %vm455_vm9 = vmand %vm454_vm8, %vm84_vm3  ;;  %vm542_vm8 = vcmask 509304  }
  0xea   :  { %v243_v0 = vld [vmem:[#allocation2 + $0x8] sm:$0x3] }
  0xeb   :  { %v244_v1 = vsel %vm242_vm14, %v239_v63, %v243_v0  ;;  %vm317_vm14 = vcmask 394504  }
  0xec   :  { %245 = vst [vmem:[#allocation2 + $0x8] sm:$0x3] %v244_v1  ;;  %vm318_vm15 = vmand %vm317_vm14, %vm84_vm3  ;;  %v554_v1 = vpop.permute.xlu1 %553 }
  0xf0   :  { %v582_v8 = vpop.permute.xlu1 %581 }
  0xf3   :  { %v257_v3 = vld [vmem:[#allocation2 + $0x8] sm:$0x3] }
  0xf4   :  { %v258_v4 = vsel %vm256_vm0, %v253_v2, %v257_v3  ;;  %vm352_vm0 = vcmask 837304  }
  0xf5   :  { %259 = vst [vmem:[#allocation2 + $0x8] sm:$0x3] %v258_v4  ;;  %vm353_vm2 = vmand %vm352_vm0, %vm84_vm3  ;;  %v568_v4 = vpop.permute.xlu0 %567 }
  0xfc   :  { %v271_v6 = vld [vmem:[#allocation2 + $0x8] sm:$0x3] }
  0xfd   :  { %v272_v7 = vsel %vm270_vm4, %v267_v5, %v271_v6  ;;  %vm365_vm4 = vcmask 984904  }
  0xfe   :  { %273 = vst [vmem:[#allocation2 + $0x8] sm:$0x3] %v272_v7  ;;  %vm366_vm6 = vmand %vm365_vm4, %vm84_vm3  ;;  %v2721_v7 = vpop.permute.xlu0 %603 }
 0x105   :  { %v291_v47 = vld [vmem:[#allocation2 + $0x8] sm:$0x33] }
 0x106   :  { %v292_v48 = vsel %vm290_vm11, %v284_v9, %v291_v47  ;;  %vm378_vm11 = vcmask 1006592  }
 0x107   :  { %293 = vst [vmem:[#allocation2 + $0x8] sm:$0x33] %v292_v48  ;;  %v379_v31 = vsel %vm378_vm11, %v377_v30, %v376_v29  ;;  %vm483_vm11 = vmand %vm482_vm10, %vm84_vm3  ;;  %vm556_vm10 = vcmask 656904   ;;  %v2724_v48 = vpop.permute.xlu1 %637 }
 0x10e   :  { %v305_v11 = vld [vmem:[#allocation2 + $0xc] sm:$0x3]  ;;  %v2679_v12 = vld [vmem:[#allocation2 + $0x4] sm:$0xff] }
 0x10f   :  { %v306_v13 = vsel %vm304_vm13, %v301_v10, %v305_v11  ;;  %736 = vrot.lane.b32.xlu0 %v2679_v12, %s2400_s28  ;;  %vm398_vm13 = vcmask 230504  }
 0x110   :  { %307 = vst [vmem:[#allocation2 + $0xc] sm:$0x3] %v306_v13  ;;  %vm399_vm14 = vmand %vm398_vm13, %vm84_vm3  ;;  %vm500_vm13 = vcmask 70660  }
 0x113   :  { %768 = vrot.lane.b32.xlu0 %v2679_v12, %s2428_s17 }
 0x117   :  { %v319_v15 = vld [vmem:[#allocation2 + $0xc] sm:$0x3]  ;;  %801 = vrot.lane.b32.xlu0 %v2679_v12, %s2429_s18 }
 0x118   :  { %v320_v20 = vsel %vm318_vm15, %v315_v14, %v319_v15  ;;  %vm412_vm15 = vcmask 378104  }
 0x119   :  { %321 = vst [vmem:[#allocation2 + $0xc] sm:$0x3] %v320_v20  ;;  %vm413_vm0 = vmand %vm412_vm15, %vm84_vm3 }
 0x11a   :  { %vm501_vm15 = vmand %vm500_vm13, %vm172_vm1  ;;  %vm528_vm1 = vcmask 361704  }
 0x11b   :  { %834 = vrot.lane.b32.xlu0 %v2679_v12, %s2399_s27 }
 0x120   :  { %v354_v22 = vld [vmem:[#allocation2 + $0xc] sm:$0x3] }
 0x121   :  { %v355_v24 = vsel %vm353_vm2, %v350_v21, %v354_v22  ;;  %vm426_vm2 = vcmask 525704  }
 0x122   :  { %356 = vst [vmem:[#allocation2 + $0xc] sm:$0x3] %v355_v24  ;;  %vm427_vm4 = vmand %vm426_vm2, %vm84_vm3 }
 0x129   :  { %v367_v27 = vld [vmem:[#allocation2 + $0xc] sm:$0x3] }
 0x12a   :  { %v368_v28 = vsel %vm366_vm6, %v363_v26, %v367_v27  ;;  %vm440_vm6 = vcmask 673304  }
 0x12b   :  { %369 = vst [vmem:[#allocation2 + $0xc] sm:$0x3] %v368_v28  ;;  %vm441_vm7 = vmand %vm440_vm6, %vm84_vm3 }
 0x132   :  { %v386_v32 = vld [vmem:[#allocation2 + $0xc] sm:$0x33] }
 0x133   :  { %v387_v33 = vsel %vm385_vm12, %v379_v31, %v386_v32  ;;  %vm498_vm12 = vcmask 1042376   ;;  %v659_v31 = vld [vmem:[#allocation2 + $0x18] sm:$0xf] }
 0x134   :  { %388 = vst [vmem:[#allocation2 + $0xc] sm:$0x33] %v387_v33 }
 0x13b   :  { %v400_v35 = vld [vmem:[#allocation2 + $0x10] sm:$0x3]  ;;  %v590_v36 = vld [vmem:[#allocation2 + $0x8] sm:$0xff] }
 0x13c   :  { %v401_v37 = vsel %vm399_vm14, %v396_v34, %v400_v35  ;;  %599 = vrot.lane.b32.xlu1 %v590_v36, %s2394_s0  ;;  %vm499_vm14 = vmand %vm498_vm12, %vm84_vm3  ;;  %vm570_vm12 = vcmask 804504   ;;  %v692_v34 = vld [vmem:[#allocation2 + $0x18] sm:$0xf] }
 0x13d   :  { %402 = vst [vmem:[#allocation2 + $0x10] sm:$0x3] %v401_v37  ;;  %vm502_vm2 = vmor %vm501_vm15, %vm499_vm14  ;;  %vm584_vm14 = vcmask 952104  }
 0x13e   :  { %vm571_vm13 = vmand %vm570_vm12, %vm84_vm3 }
 0x13f   :  { %vm585_vm15 = vmand %vm584_vm14, %vm84_vm3 }
 0x140   :  { %633 = vrot.lane.b32.xlu1 %v590_v36, %s2426_s15 }
 0x142   :  { %v598_v16 = vpop.permute.xlu0 %597 }
 0x143   :  { %v605_v15 = vrot.slane %v598_v16, 4 }
 0x144   :  { %v414_v39 = vld [vmem:[#allocation2 + $0x10] sm:$0x3]  ;;  %666 = vrot.lane.b32.xlu1 %v590_v36, %s2401_s29 }
 0x145   :  { %v415_v40 = vsel %vm413_vm0, %v410_v38, %v414_v39  ;;  %vm495_vm0 = vcmask 990208  }
 0x146   :  { %416 = vst [vmem:[#allocation2 + $0x10] sm:$0x3] %v415_v40  ;;  %v496_v52 = vsel %vm495_vm0, %v494_v18, %v493_v51  ;;  %v632_v10 = vpop.permute.xlu0 %631  ;;  %vm609_vm0 = vcmask 1043456  }
 0x147   :  { %v639_v22 = vrot.slane %v632_v10, 4 }
 0x148   :  { %699 = vrot.lane.b32.xlu1 %v590_v36, %s2427_s16 }
 0x14a   :  { %v665_v20 = vpop.permute.xlu0 %664 }
 0x14b   :  { %v672_v37 = vrot.slane %v665_v20, 4 }
 0x14d   :  { %v428_v42 = vld [vmem:[#allocation2 + $0x10] sm:$0x3] }
 0x14e   :  { %v429_v43 = vsel %vm427_vm4, %v424_v41, %v428_v42  ;;  %vm514_vm4 = vcmask 214104   ;;  %v698_v36 = vpop.permute.xlu0 %697 }
 0x14f   :  { %430 = vst [vmem:[#allocation2 + $0x10] sm:$0x3] %v429_v43  ;;  %vm515_vm6 = vmand %vm514_vm4, %vm84_vm3  ;;  %vm677_vm4 = vcmask 138240   ;;  %v705_v39 = vrot.slane %v698_v36, 4 }
 0x156   :  { %v442_v45 = vld [vmem:[#allocation2 + $0x10] sm:$0x3] }
 0x157   :  { %v443_v17 = vsel %vm441_vm7, %v438_v44, %v442_v45  ;;  %vm529_vm7 = vmand %vm528_vm1, %vm84_vm3  ;;  %vm781_vm1 = vcmask 908288  }
 0x158   :  { %444 = vst [vmem:[#allocation2 + $0x10] sm:$0x3] %v443_v17  ;;  %v731_v17 = vld [vmem:[#allocation2 + $0x1c] sm:$0xf] }
 0x15f   :  { %v456_v19 = vld [vmem:[#allocation2 + $0x10] sm:$0x3] }
 0x160   :  { %v457_v23 = vsel %vm455_vm9, %v452_v25, %v456_v19  ;;  %vm543_vm9 = vmand %vm542_vm8, %vm84_vm3  ;;  %vm847_vm8 = vcmask 891904  }
 0x161   :  { %458 = vst [vmem:[#allocation2 + $0x10] sm:$0x3] %v457_v23  ;;  %v763_v23 = vld [vmem:[#allocation2 + $0x1c] sm:$0xf] }
 0x168   :  { %v484_v49 = vld [vmem:[#allocation2 + $0x10] sm:$0x3] }
 0x169   :  { %v485_v50 = vsel %vm483_vm11, %v480_v46, %v484_v49  ;;  %vm557_vm11 = vmand %vm556_vm10, %vm84_vm3  ;;  %vm611_vm3 = vcmask 154624   ;;  %v829_v46 = vld [vmem:[#allocation2 + $0x1c] sm:$0xf]  ;;  %vm2077_vm10 = vcmask 130048  }
 0x16a   :  { %486 = vst [vmem:[#allocation2 + $0x10] sm:$0x3] %v485_v50  ;;  %v796_v49 = vld [vmem:[#allocation2 + $0x1c] sm:$0xf]  ;;  %v887_v50 = vld [vmem:[%s3115_s2] sm:$0xff] }
 0x171   :  { %v503_v53 = vld [vmem:[#allocation2 + $0x10] sm:$0x33] }
 0x172   :  { %v504_v54 = vsel %vm502_vm2, %v496_v52, %v503_v53  ;;  %vm644_vm2 = vcmask 146432  }
 0x173   :  { %505 = vst [vmem:[#allocation2 + $0x10] sm:$0x33] %v504_v54 }
 0x17a   :  { %v2707_v56 = vld [vmem:[#allocation2 + $0xc] sm:$0xff]  ;;  %v516_v57 = vld [vmem:[#allocation2 + $0x14] sm:$0x3] }
 0x17b   :  { %738 = vrot.lane.b32.xlu1 %v2707_v56, %s2400_s28  ;;  %v517_v58 = vsel %vm515_vm6, %v512_v55, %v516_v57  ;;  %vm710_vm6 = vcmask 7168  }
 0x17c   :  { %518 = vst [vmem:[#allocation2 + $0x14] sm:$0x3] %v517_v58 }
 0x17f   :  { %770 = vrot.lane.b32.xlu1 %v2707_v56, %s2428_s17 }
 0x181   :  { %v737_v51 = vpop.permute.xlu0 %736 }
 0x182   :  { %v744_v53 = vrot.slane %v737_v51, 4 }
 0x183   :  { %v530_v60 = vld [vmem:[#allocation2 + $0x14] sm:$0x3]  ;;  %803 = vrot.lane.b32.xlu1 %v2707_v56, %s2429_s18 }
 0x184   :  { %v531_v61 = vsel %vm529_vm7, %v526_v59, %v530_v60  ;;  %vm814_vm7 = vcmask 900096  }
 0x185   :  { %532 = vst [vmem:[#allocation2 + $0x14] sm:$0x3] %v531_v61  ;;  %v769_v18 = vpop.permute.xlu0 %768 }
 0x187   :  { %836 = vrot.lane.b32.xlu1 %v2707_v56, %s2399_s27 }
 0x189   :  { %v802_v57 = vpop.permute.xlu0 %801 }
 0x18c   :  { %v544_v63 = vld [vmem:[#allocation2 + $0x14] sm:$0x3] }
 0x18d   :  { %v545_v0 = vsel %vm543_vm9, %v540_v62, %v544_v63  ;;  %v776_v63 = vrot.slane %v769_v18, 4  ;;  %vm1028_vm9 = vcmask 588800  }
 0x18e   :  { %546 = vst [vmem:[#allocation2 + $0x14] sm:$0x3] %v545_v0 }
 0x195   :  { %v558_v2 = vld [vmem:[#allocation2 + $0x14] sm:$0x3] }
 0x196   :  { %v559_v3 = vsel %vm557_vm11, %v554_v1, %v558_v2  ;;  %v809_v1 = vrot.slane %v802_v57, 4  ;;  %vm2151_vm11 = vcmask 74752  }
 0x197   :  { %560 = vst [vmem:[#allocation2 + $0x14] sm:$0x3] %v559_v3 }
 0x19e   :  { %v572_v5 = vld [vmem:[#allocation2 + $0x14] sm:$0x3] }
 0x19f   :  { %v573_v6 = vsel %vm571_vm13, %v568_v4, %v572_v5  ;;  %v835_v4 = vpop.permute.xlu0 %834 }
 0x1a0   :  { %574 = vst [vmem:[#allocation2 + $0x14] sm:$0x3] %v573_v6 }
 0x1a7   :  { %v586_v9 = vld [vmem:[#allocation2 + $0x14] sm:$0x3] }
 0x1a8   :  { %v587_v47 = vsel %vm585_vm15, %v582_v8, %v586_v9 }
 0x1a9   :  { %588 = vst [vmem:[#allocation2 + $0x14] sm:$0x3] %v587_v47 }
 0x1ae   :  { %v2726_v11 = vpop.permute.xlu1 %599 }
 0x1af   :  { %v606_v13 = vrot.slane %v2726_v11, 4 }
 0x1b0   :  { %v625_v14 = vld [vmem:[#allocation2 + $0x10] sm:$0xff] }
 0x1b1   :  { %635 = vrot.lane.b32.xlu1 %v625_v14, %s2426_s15  ;;  %601 = vrot.lane.b32.xlu0 %v625_v14, %s2394_s0  ;;  %v610_v26 = vsel %vm609_vm0, %v605_v15, %v606_v13  ;;  %v2755_v42 = vld [vmem:[#allocation2 + $0x14] sm:$0xff] }
 0x1b2   :  { %v2731_v21 = vpop.permute.xlu1 %633  ;;  %v612_v29 = vsel %vm611_vm3, %v598_v16, %v610_v26  ;;  %v842_v16 = vrot.slane %v835_v4, 4 }
 0x1b3   :  { %v640_v24 = vrot.slane %v2731_v21, 4 }
 0x1b5   :  { %701 = vrot.lane.b32.xlu1 %v625_v14, %s2427_s16  ;;  %668 = vrot.lane.b32.xlu0 %v625_v14, %s2401_s29  ;;  %v643_v27 = vsel %vm609_vm0, %v639_v22, %v640_v24 }
 0x1b6   :  { %v2742_v28 = vpop.permute.xlu1 %666  ;;  %v645_v30 = vsel %vm644_vm2, %v632_v10, %v643_v27  ;;  %v2812_v27 = vld [vmem:[%s3114_s1] sm:$0xf] }
 0x1b7   :  { %v673_v32 = vrot.slane %v2742_v28, 4  ;;  %v2181_v33 = vcombine.high %v612_v29, %v645_v30  ;;  %v2180_v35 = vcombine.low %v612_v29, %v645_v30  ;;  %v2816_v29 = vld [vmem:[#allocation2 + $0x18] sm:$0xff] }
 0x1b9   :  { %1051 = vmatprep.subr.bf16.mxu0 %v2181_v33  ;;  %670 = vrot.lane.b32.xlu1 %v659_v31, %s2401_s29  ;;  %v676_v40 = vsel %vm609_vm0, %v672_v37, %v673_v32  ;;  %v608_v33 = vrot.slane %v2721_v7, 4 }
 0x1ba   :  { %703 = vrot.lane.b32.xlu0 %v692_v34, %s2427_s16  ;;  %1052 = vmatpush1.bf16.msra.mxu0 %v2180_v35  ;;  %v2749_v38 = vpop.permute.xlu1 %699  ;;  %v678_v44 = vsel %vm677_vm4, %v665_v20, %v676_v40  ;;  %v642_v34 = vrot.slane %v2724_v48, 4 }
 0x1bb   :  { %v706_v41 = vrot.slane %v2749_v38, 4 }
 0x1bd   :  { %v709_v43 = vsel %vm609_vm0, %v705_v39, %v706_v41  ;;  %772 = vrot.lane.b32.xlu1 %v2755_v42, %s2428_s17 }
 0x1be   :  { %740 = vrot.lane.b32.xlu0 %v2755_v42, %s2400_s28  ;;  %v711_v45 = vsel %vm710_vm6, %v698_v36, %v709_v43 }
 0x1bf   :  { %v2187_v25 = vcombine.high %v678_v44, %v711_v45  ;;  %v2186_v19 = vcombine.low %v678_v44, %v711_v45 }
 0x1c1   :  { %1053 = vmatprep.subr.bf16.mxu0 %v2187_v25  ;;  %742 = vrot.lane.b32.xlu1 %v731_v17, %s2400_s28 }
 0x1c2   :  { %805 = vrot.lane.b32.xlu0 %v2755_v42, %s2429_s18  ;;  %1054 = vmatpush1.bf16.msra.mxu0 %v2186_v19 }
 0x1c5   :  { %774 = vrot.lane.b32.xlu1 %v763_v23, %s2428_s17 }
 0x1c6   :  { %838 = vrot.lane.b32.xlu0 %v2755_v42, %s2399_s27 }
 0x1c9   :  { %840 = vrot.lane.b32.xlu1 %v829_v46, %s2399_s27 }
 0x1ca   :  { %807 = vrot.lane.b32.xlu0 %v796_v49, %s2429_s18 }
 0x1ce   :  { %890 = vperm.xlu0 %2337, %v887_v50  }
 0x1ed   :  { %v2777_v52 = vpop.permute.xlu1 %738 }
 0x1ee   :  { %v745_v54 = vrot.slane %v2777_v52, 4 }
 0x1f0   :  { %v748_v55 = vsel %vm609_vm0, %v744_v53, %v745_v54 }
 0x1f1   :  { %v2783_v58 = vpop.permute.xlu1 %770  ;;  %v749_v59 = vsel %vm166_vm5, %v737_v51, %v748_v55 }
 0x1f2   :  { %v777_v60 = vrot.slane %v2783_v58, 4  ;;  %v2193_v61 = vcombine.high %v2679_v12, %v749_v59  ;;  %v2192_v62 = vcombine.low %v2679_v12, %v749_v59 }
 0x1f4   :  { %1055 = vmatprep.subr.bf16.mxu0 %v2193_v61  ;;  %v780_v2 = vsel %vm609_vm0, %v776_v63, %v777_v60 }
 0x1f5   :  { %1056 = vmatpush1.bf16.msra.mxu0 %v2192_v62  ;;  %v2789_v0 = vpop.permute.xlu1 %803  ;;  %v782_v6 = vsel %vm781_vm1, %v769_v18, %v780_v2 }
 0x1f6   :  { %v810_v3 = vrot.slane %v2789_v0, 4 }
 0x1f8   :  { %v813_v5 = vsel %vm609_vm0, %v809_v1, %v810_v3 }
 0x1f9   :  { %v2798_v12 = vpop.permute.xlu1 %836  ;;  %v815_v8 = vsel %vm814_vm7, %v802_v57, %v813_v5 }
 0x1fa   :  { %v843_v9 = vrot.slane %v2798_v12, 4  ;;  %v2199_v47 = vcombine.high %v782_v6, %v815_v8  ;;  %v2198_v10 = vcombine.low %v782_v6, %v815_v8 }
 0x1fc   :  { %v846_v14 = vsel %vm609_vm0, %v842_v16, %v843_v9  ;;  %1057 = vmatprep.subr.bf16.mxu0 %v2199_v47 }
 0x1fd   :  { %1058 = vmatpush1.bf16.msra.mxu0 %v2198_v10  ;;  %v848_v15 = vsel %vm847_vm8, %v835_v4, %v846_v14 }
 0x1fe   :  { %v2205_v20 = vcombine.high %v848_v15, %v848_v15  ;;  %v2204_v22 = vcombine.low %v848_v15, %v848_v15 }
 0x200   :  { %2210 = vmatprep.subr.msk.bf16.mxu0 %vm609_vm0, %v2205_v20  ;;  %v1034_v26 = vsel %vm609_vm0, %v2204_v22, 0 }
 0x201   :  { %1060 = vmatpush1.bf16.msra.mxu0 %v1034_v26 }
 0x204   :  { %2211 = vmatmul.mubr.msk.bf16.vlgmr.msra.gmra.mrb[0].mxu0 %vm1028_vm9, %v2812_v27 }
 0x205   :  { %1165 = vmatprep.mubr.bf16.mxu0 %v2816_v29 }
 0x223   :  { %v636_v30 = vpop.permute.xlu1 %635  ;;  %v602_v31 = vpop.permute.xlu0 %601 }
 0x224   :  { %v641_v35 = vrot.slane %v636_v30, 4  ;;  %v607_v36 = vrot.slane %v602_v31, 4 }
 0x226   :  { %v648_v37 = vsel %vm609_vm0, %v641_v35, %v642_v34  ;;  %v615_v39 = vsel %vm609_vm0, %v607_v36, %v608_v33  ;;  %v613_v40 = vsel %vm609_vm0, %v606_v13, %v607_v36  ;;  %v646_v43 = vsel %vm609_vm0, %v640_v24, %v641_v35 }
 0x227   :  { %v649_v44 = vsel %vm644_vm2, %v636_v30, %v648_v37  ;;  %v616_v7 = vsel %vm611_vm3, %v602_v31, %v615_v39  ;;  %v702_v45 = vpop.permute.xlu1 %701  ;;  %v669_v48 = vpop.permute.xlu0 %668  ;;  %v614_v17 = vsel %vm611_vm3, %v2726_v11, %v613_v40  ;;  %v647_v25 = vsel %vm644_vm2, %v2731_v21, %v646_v43 }
 0x228   :  { %v2184_v19 = vcombine.low %v616_v7, %v649_v44  ;;  %v2185_v23 = vcombine.high %v616_v7, %v649_v44  ;;  %v707_v46 = vrot.slane %v702_v45, 4  ;;  %v674_v13 = vrot.slane %v669_v48, 4 }
 0x229   :  { %v2183_v49 = vcombine.high %v614_v17, %v647_v25  ;;  %v2182_v50 = vcombine.low %v614_v17, %v647_v25 }
 0x22a   :  { %v712_v24 = vsel %vm609_vm0, %v706_v41, %v707_v46  ;;  %v679_v51 = vsel %vm609_vm0, %v673_v32, %v674_v13  ;;  %1133 = vmatprep.subr.bf16.mxu0 %v2185_v23 }
 0x22b   :  { %1092 = vmatprep.subr.bf16.mxu1 %v2183_v49  ;;  %v671_v11 = vpop.permute.xlu1 %670  ;;  %1134 = vmatpush1.bf16.msra.mxu0 %v2184_v19  ;;  %v680_v21 = vsel %vm677_vm4, %v2742_v28, %v679_v51  ;;  %v713_v18 = vsel %vm710_vm6, %v2749_v38, %v712_v24  ;;  %v1182_v24 = vlaneseq }
 0x22c   :  { %v675_v53 = vrot.slane %v671_v11, 4  ;;  %1093 = vmatpush1.bf16.msra.mxu1 %v2182_v50  ;;  %v704_v55 = vpop.permute.xlu0 %703  ;;  %v2189_v57 = vcombine.high %v680_v21, %v713_v18  ;;  %v2188_v59 = vcombine.low %v680_v21, %v713_v18  ;;  %v1180_v21 = vld [vmem:[%s3118_s5] sm:$0x3f] }
 0x22d   :  { %v708_v41 = vrot.slane %v704_v55, 4  ;;  %v2891_v51 = vshrl.u32 %v1182_v24, 7 }
 0x22e   :  { %v681_v61 = vsel %vm609_vm0, %v674_v13, %v675_v53  ;;  %1094 = vmatprep.subr.bf16.mxu1 %v2189_v57 }
 0x22f   :  { %v714_v32 = vsel %vm609_vm0, %v707_v46, %v708_v41  ;;  %v773_v62 = vpop.permute.xlu1 %772  ;;  %v682_v63 = vsel %vm677_vm4, %v669_v48, %v681_v61  ;;  %v1184_v11 = vsub.s32 0, %v2891_v51  ;;  %v1188_v18 = vsub.s32 1, %v2891_v51 }
 0x230   :  { %1095 = vmatpush1.bf16.msra.mxu1 %v2188_v59  ;;  %v741_v1 = vpop.permute.xlu0 %740  ;;  %v715_v28 = vsel %vm710_vm6, %v702_v45, %v714_v32  ;;  %v778_v2 = vrot.slane %v773_v62, 4 }
 0x231   :  { %v746_v38 = vrot.slane %v741_v1, 4  ;;  %v2190_v4 = vcombine.low %v682_v63, %v715_v28  ;;  %v2191_v5 = vcombine.high %v682_v63, %v715_v28  ;;  %v1185_v59 = vrot.slane %v1180_v21, %v1184_v11 }
 0x232   :  { %v783_v14 = vsel %vm609_vm0, %v777_v60, %v778_v2  ;;  %v1189_v61 = vrot.slane %v1180_v21, %v1188_v18 }
 0x233   :  { %v750_v6 = vsel %vm609_vm0, %v745_v54, %v746_v38  ;;  %1135 = vmatprep.subr.bf16.mxu0 %v2191_v5  ;;  %v743_v8 = vpop.permute.xlu1 %742  ;;  %v784_v60 = vsel %vm781_vm1, %v2783_v58, %v783_v14  ;;  %v1192_v5 = vsub.s32 2, %v2891_v51 }
 0x234   :  { %v747_v16 = vrot.slane %v743_v8, 4  ;;  %1136 = vmatpush1.bf16.msra.mxu0 %v2190_v4  ;;  %v806_v47 = vpop.permute.xlu0 %805  ;;  %v751_v10 = vsel %vm166_vm5, %v2777_v52, %v750_v6  ;;  %v1196_v6 = vsub.s32 3, %v2891_v51 }
 0x235   :  { %v811_v15 = vrot.slane %v806_v47, 4  ;;  %v2195_v20 = vcombine.high %v2707_v56, %v751_v10  ;;  %v2194_v22 = vcombine.low %v2707_v56, %v751_v10 }
 0x236   :  { %v752_v26 = vsel %vm609_vm0, %v746_v38, %v747_v16 }
 0x237   :  { %v816_v54 = vsel %vm609_vm0, %v810_v3, %v811_v15  ;;  %1096 = vmatprep.subr.bf16.mxu1 %v2195_v20  ;;  %v775_v30 = vpop.permute.xlu1 %774  ;;  %v753_v31 = vsel %vm166_vm5, %v741_v1, %v752_v26 }
 0x238   :  { %1097 = vmatpush1.bf16.msra.mxu1 %v2194_v22  ;;  %v839_v52 = vpop.permute.xlu0 %838  ;;  %v817_v33 = vsel %vm814_vm7, %v2789_v0, %v816_v54  ;;  %v2196_v56 = vcombine.low %v2755_v42, %v753_v31  ;;  %v2197_v34 = vcombine.high %v2755_v42, %v753_v31  ;;  %v779_v35 = vrot.slane %v775_v30, 4 }
 0x239   :  { %v844_v36 = vrot.slane %v839_v52, 4  ;;  %v2201_v37 = vcombine.high %v784_v60, %v817_v33  ;;  %v2200_v3 = vcombine.low %v784_v60, %v817_v33  ;;  %v1200_v31 = vsub.s32 4, %v2891_v51 }
 0x23a   :  { %1137 = vmatprep.subr.bf16.mxu0 %v2197_v34  ;;  %v785_v42 = vsel %vm609_vm0, %v778_v2, %v779_v35  ;;  %v1204_v60 = vsub.s32 5, %v2891_v51 }
 0x23b   :  { %v849_v39 = vsel %vm609_vm0, %v843_v9, %v844_v36  ;;  %1098 = vmatprep.subr.bf16.mxu1 %v2201_v37  ;;  %v841_v40 = vpop.permute.xlu1 %840  ;;  %1138 = vmatpush1.bf16.msra.mxu0 %v2196_v56  ;;  %v786_v19 = vsel %vm781_vm1, %v773_v62, %v785_v42  ;;  %v1201_v35 = vrot.slane %v1180_v21, %v1200_v31 }
 0x23c   :  { %v845_v58 = vrot.slane %v841_v40, 4  ;;  %1099 = vmatpush1.bf16.msra.mxu1 %v2200_v3  ;;  %v808_v43 = vpop.permute.xlu0 %807  ;;  %v850_v0 = vsel %vm847_vm8, %v2798_v12, %v849_v39  ;;  %v1205_v3 = vrot.slane %v1180_v21, %v1204_v60 }
 0x23d   :  { %v812_v44 = vrot.slane %v808_v43, 4  ;;  %v2207_v7 = vcombine.high %v850_v0, %v850_v0  ;;  %v2206_v45 = vcombine.low %v850_v0, %v850_v0 }
 0x23e   :  { %v851_v48 = vsel %vm609_vm0, %v844_v36, %v845_v58 }
 0x23f   :  { %v818_v17 = vsel %vm609_vm0, %v811_v15, %v812_v44  ;;  %2212 = vmatprep.subr.msk.bf16.mxu1 %vm609_vm0, %v2207_v7  ;;  %v1040_v9 = vsel %vm609_vm0, %v2206_v45, 0  ;;  %v852_v25 = vsel %vm847_vm8, %v839_v52, %v851_v48  ;;  %v1197_v15 = vrot.slane %v1180_v21, %v1196_v6 }
 0x240   :  { %1101 = vmatpush1.bf16.msra.mxu1 %v1040_v9  ;;  %v819_v12 = vsel %vm814_vm7, %v806_v47, %v818_v17  ;;  %v2209_v13 = vcombine.high %v852_v25, %v852_v25  ;;  %v2208_v49 = vcombine.low %v852_v25, %v852_v25  ;;  %v1193_v47 = vrot.slane %v1180_v21, %v1192_v5  ;;  %v1384_v9 = vld [vmem:[#allocation4 + $0x1c] sm:$0xf] }
 0x241   :  { %v2202_v23 = vcombine.low %v786_v19, %v819_v12  ;;  %v2203_v46 = vcombine.high %v786_v19, %v819_v12  ;;  %v1448_v19 = vld [vmem:[#allocation4 + $0x1c] sm:$0xf]  ;;  %v1538_v12 = vld [vmem:[%s3117_s4] sm:$0xff] }
 0x242   :  { %v1046_v50 = vsel %vm609_vm0, %v2208_v49, 0  ;;  %v1539_v49 = vld [vmem:[%s3117_s4 + $0x8] sm:$0xff] }
 0x243   :  { %2213 = vmatmul.mubr.msk.bf16.vlgmr.msra.gmra.mrb[0].mxu1 %vm1028_vm9, %v2812_v27  ;;  %1139 = vmatprep.subr.bf16.mxu0 %v2203_v46  ;;  %v1416_v46 = vld [vmem:[#allocation4 + $0x1c] sm:$0xf] }
 0x244   :  { %1140 = vmatpush1.bf16.msra.mxu0 %v2202_v23  ;;  %1743 = vmatprep.mubr.bf16.mxu1 %v2816_v29 }
 0x245   :  { %2214 = vmatprep.subr.msk.bf16.mxu0 %vm609_vm0, %v2209_v13  ;;  %v1480_v13 = vld [vmem:[#allocation4 + $0x1c] sm:$0xf] }
 0x248   :  { %1142 = vmatpush1.bf16.msra.mxu0 %v1046_v50 }
 0x24b   :  { %2215 = vmatmul.mubr.msk.bf16.vlgmr.msra.gmra.mrb[4].mxu0 %vm1028_vm9, %v2812_v27 }
 0x24c   :  { %1786 = vmatprep.mubr.bf16.mxu0 %v2816_v29 }
 0x24d   :  { %v891_v53 = vpop.permute.xlu0 %890 }
 0x2d7   :  { %v1085_v55 = vpop.f32.mrb[0].mxu0 }
 0x2d8   :  { %v1087_v57 = vpop.f32.mrb[1].mxu0  ;;  %v1086_v41 = vadd.f32 %v1085_v55, %v891_v53 }
 0x2d9   :  { %v1088_v27 = vadd.f32 %v1087_v57, %v891_v53  ;;  %v1089_v32 = vpop.f32.mrb[2].mxu0 }
 0x2da   :  { %v1174_v62 = vmax.f32 %v1086_v41, 0.0  ;;  %v1090_v63 = vpop.f32.mrb[3].mxu0 }
 0x2db   :  { %v1175_v1 = vmax.f32 %v1088_v27, 0.0 }
 0x2dc   :  { %v1212_v28 = vmul.f32 %v1185_v59, %v1174_v62 }
 0x2dd   :  { %v1213_v2 = vmul.f32 %v1189_v61, %v1175_v1 }
 0x2df   :  { %v2898_v38 = vpack.c.bf16 %v1213_v2, %v1212_v28 }
 0x2e1   :  { %1244 = vst [vmem:[#allocation4 + $0x4] sm:$0xff] %v2898_v38 }
 0x2e8   :  { %v1279_v4 = vld [vmem:[#allocation4] sm:$0xff] }
 0x2e9   :  { %1287 = vrot.lane.b32.xlu0 %v1279_v4, %s2426_s15  ;;  %1255 = vrot.lane.b32.xlu1 %v1279_v4, %s2394_s0 }
 0x2ed   :  { %1319 = vrot.lane.b32.xlu0 %v1279_v4, %s2401_s29  ;;  %1485 = vrot.lane.b32.xlu1 %v2898_v38, %s2399_s27 }
 0x2f1   :  { %1351 = vrot.lane.b32.xlu0 %v1279_v4, %s2427_s16 }
 0x2f5   :  { %1389 = vrot.lane.b32.xlu0 %v2898_v38, %s2400_s28 }
 0x2f9   :  { %1421 = vrot.lane.b32.xlu0 %v2898_v38, %s2428_s17 }
 0x2fd   :  { %1453 = vrot.lane.b32.xlu0 %v2898_v38, %s2429_s18 }
 0x316   :  { %v1126_v8 = vpop.f32.mrb[0].mxu1 }
 0x317   :  { %v1127_v16 = vadd.f32 %v1126_v8, %v891_v53  ;;  %v1128_v10 = vpop.f32.mrb[1].mxu1 }
 0x318   :  { %v1129_v14 = vadd.f32 %v1128_v10, %v891_v53  ;;  %v1130_v20 = vpop.f32.mrb[2].mxu1 }
 0x319   :  { %v1176_v22 = vmax.f32 %v1127_v16, 0.0  ;;  %v1131_v26 = vpop.f32.mrb[3].mxu1 }
 0x31a   :  { %v1177_v54 = vmax.f32 %v1129_v14, 0.0 }
 0x31b   :  { %v1214_v30 = vmul.f32 %v1193_v47, %v1176_v22 }
 0x31c   :  { %v1215_v52 = vmul.f32 %v1197_v15, %v1177_v54 }
 0x31e   :  { %v2917_v33 = vpack.c.bf16 %v1215_v52, %v1214_v30  ;;  %v1167_v56 = vpop.f32.mrb[4].mxu0 }
 0x31f   :  { %v1168_v34 = vadd.f32 %v1167_v56, %v891_v53  ;;  %v1169_v36 = vpop.f32.mrb[5].mxu0 }
 0x320   :  { %1245 = vst [vmem:[#allocation4 + $0xc] sm:$0xff] %v2917_v33  ;;  %v1170_v37 = vadd.f32 %v1169_v36, %v891_v53  ;;  %v1171_v39 = vpop.f32.mrb[6].mxu0 }
 0x321   :  { %v1178_v40 = vmax.f32 %v1168_v34, 0.0  ;;  %v1172_v58 = vpop.f32.mrb[7].mxu0 }
 0x322   :  { %v1179_v43 = vmax.f32 %v1170_v37, 0.0 }
 0x323   :  { %v1216_v0 = vmul.f32 %v1201_v35, %v1178_v40 }
 0x324   :  { %v1217_v42 = vmul.f32 %v1205_v3, %v1179_v43 }
 0x326   :  { %v2920_v44 = vpack.c.bf16 %v1217_v42, %v1216_v0 }
 0x327   :  { %v1248_v7 = vld [vmem:[#allocation4 + $0x8] sm:$0xff] }
 0x328   :  { %1246 = vst [vmem:[#allocation4 + $0x14] sm:$0xff] %v2920_v44  ;;  %1257 = vrot.lane.b32.xlu1 %v1248_v7, %s2394_s0 }
 0x32c   :  { %1289 = vrot.lane.b32.xlu1 %v1248_v7, %s2426_s15 }
 0x32f   :  { %v1249_v45 = vld [vmem:[#allocation4 + $0x10] sm:$0xff]  ;;  %v1282_v48 = vld [vmem:[#allocation4 + $0x18] sm:$0xf] }
 0x330   :  { %1259 = vrot.lane.b32.xlu0 %v1249_v45, %s2394_s0  ;;  %1321 = vrot.lane.b32.xlu1 %v1248_v7, %s2401_s29  ;;  %v1346_v17 = vld [vmem:[#allocation4 + $0x18] sm:$0xf] }
 0x331   :  { %v1250_v25 = vld [vmem:[#allocation4 + $0x18] sm:$0xf] }
 0x332   :  { %v1314_v23 = vld [vmem:[#allocation4 + $0x18] sm:$0xf] }
 0x334   :  { %1323 = vrot.lane.b32.xlu0 %v1249_v45, %s2401_s29  ;;  %1353 = vrot.lane.b32.xlu1 %v1248_v7, %s2427_s16 }
 0x338   :  { %1393 = vrot.lane.b32.xlu0 %v2920_v44, %s2400_s28  ;;  %1291 = vrot.lane.b32.xlu1 %v1249_v45, %s2426_s15 }
 0x33c   :  { %1487 = vrot.lane.b32.xlu0 %v2917_v33, %s2399_s27  ;;  %1391 = vrot.lane.b32.xlu1 %v2917_v33, %s2400_s28 }
 0x340   :  { %1293 = vrot.lane.b32.xlu0 %v1282_v48, %s2426_s15  ;;  %1355 = vrot.lane.b32.xlu1 %v1249_v45, %s2427_s16 }
 0x344   :  { %1457 = vrot.lane.b32.xlu0 %v2920_v44, %s2429_s18  ;;  %1423 = vrot.lane.b32.xlu1 %v2917_v33, %s2428_s17 }
 0x348   :  { %1357 = vrot.lane.b32.xlu0 %v1346_v17, %s2427_s16  ;;  %1455 = vrot.lane.b32.xlu1 %v2917_v33, %s2429_s18 }
 0x34c   :  { %1395 = vrot.lane.b32.xlu0 %v1384_v9, %s2400_s28  ;;  %1261 = vrot.lane.b32.xlu1 %v1250_v25, %s2394_s0 }
 0x350   :  { %1459 = vrot.lane.b32.xlu0 %v1448_v19, %s2429_s18  ;;  %1425 = vrot.lane.b32.xlu1 %v2920_v44, %s2428_s17 }
 0x354   :  { %1542 = vperm.xlu0 %2337, %v1538_v12   ;;  %1325 = vrot.lane.b32.xlu1 %v1314_v23, %s2401_s29 }
 0x358   :  { %1489 = vrot.lane.b32.xlu1 %v2920_v44, %s2399_s27 }
 0x35b   :  { %v1288_v50 = vpop.permute.xlu0 %1287  ;;  %v1256_v21 = vpop.permute.xlu1 %1255 }
 0x35c   :  { %1427 = vrot.lane.b32.xlu1 %v1416_v46, %s2428_s17  ;;  %v1263_v41 = vrot.slane %v1256_v21, 4  ;;  %v1295_v32 = vrot.slane %v1288_v50, 4 }
 0x35f   :  { %v1320_v24 = vpop.permute.xlu0 %1319  ;;  %v2961_v53 = vpop.permute.xlu1 %1485 }
 0x360   :  { %1491 = vrot.lane.b32.xlu1 %v1480_v13, %s2399_s27  ;;  %v1327_v47 = vrot.slane %v1320_v24, 4 }
 0x363   :  { %v1352_v11 = vpop.permute.xlu0 %1351 }
 0x364   :  { %1547 = vperm.xlu1 %2338, %v1539_v49   ;;  %v1359_v15 = vrot.slane %v1352_v11, 4 }
 0x367   :  { %v1390_v18 = vpop.permute.xlu0 %1389 }
 0x368   :  { %v1397_v3 = vrot.slane %v1390_v18, 4 }
 0x36b   :  { %v2963_v55 = vpop.permute.xlu0 %1421 }
 0x36f   :  { %v2965_v61 = vpop.permute.xlu0 %1453 }
 0x39a   :  { %v1258_v57 = vpop.permute.xlu1 %1257 }
 0x39b   :  { %v1264_v59 = vrot.slane %v1258_v57, 4 }
 0x39d   :  { %v1267_v62 = vsel %vm609_vm0, %v1263_v41, %v1264_v59 }
 0x39e   :  { %v1290_v27 = vpop.permute.xlu1 %1289  ;;  %v1268_v4 = vsel %vm611_vm3, %v1256_v21, %v1267_v62  ;;  %v1429_v62 = vrot.slane %v2963_v55, 4 }
 0x39f   :  { %v1296_v63 = vrot.slane %v1290_v27, 4 }
 0x3a1   :  { %v1299_v1 = vsel %vm609_vm0, %v1295_v32, %v1296_v63 }
 0x3a2   :  { %v2969_v28 = vpop.permute.xlu0 %1259  ;;  %v1322_v2 = vpop.permute.xlu1 %1321  ;;  %v1300_v5 = vsel %vm644_vm2, %v1288_v50, %v1299_v1 }
 0x3a3   :  { %v1328_v6 = vrot.slane %v1322_v2, 4  ;;  %v2220_v8 = vcombine.low %v1268_v4, %v1300_v5  ;;  %v2221_v16 = vcombine.high %v1268_v4, %v1300_v5  ;;  %v1265_v20 = vrot.slane %v2969_v28, 4 }
 0x3a4   :  { %v1461_v5 = vrot.slane %v2965_v61, 4 }
 0x3a5   :  { %1711 = vmatprep.subr.bf16.mxu1 %v2221_v16  ;;  %v1331_v22 = vsel %vm609_vm0, %v1327_v47, %v1328_v6  ;;  %v1269_v56 = vsel %vm609_vm0, %v1264_v59, %v1265_v20 }
 0x3a6   :  { %v2973_v10 = vpop.permute.xlu0 %1323  ;;  %1712 = vmatpush1.bf16.msra.mxu1 %v2220_v8  ;;  %v1354_v14 = vpop.permute.xlu1 %1353  ;;  %v1332_v52 = vsel %vm677_vm4, %v1320_v24, %v1331_v22  ;;  %v1270_v58 = vsel %vm611_vm3, %v1258_v57, %v1269_v56 }
 0x3a7   :  { %v1360_v26 = vrot.slane %v1354_v14, 4  ;;  %v1329_v0 = vrot.slane %v2973_v10, 4 }
 0x3a9   :  { %v1363_v54 = vsel %vm609_vm0, %v1359_v15, %v1360_v26  ;;  %v1333_v12 = vsel %vm609_vm0, %v1328_v6, %v1329_v0 }
 0x3aa   :  { %v2978_v30 = vpop.permute.xlu0 %1393  ;;  %v2980_v31 = vpop.permute.xlu1 %1291  ;;  %v1364_v60 = vsel %vm710_vm6, %v1352_v11, %v1363_v54  ;;  %v1334_v57 = vsel %vm677_vm4, %v1322_v2, %v1333_v12 }
 0x3ab   :  { %v1297_v34 = vrot.slane %v2980_v31, 4  ;;  %v2226_v35 = vcombine.low %v1332_v52, %v1364_v60  ;;  %v2227_v36 = vcombine.high %v1332_v52, %v1364_v60  ;;  %v1399_v48 = vrot.slane %v2978_v30, 4 }
 0x3ad   :  { %v1301_v37 = vsel %vm609_vm0, %v1296_v63, %v1297_v34  ;;  %1713 = vmatprep.subr.bf16.mxu1 %v2227_v36 }
 0x3ae   :  { %v2991_v39 = vpop.permute.xlu0 %1487  ;;  %1714 = vmatpush1.bf16.msra.mxu1 %v2226_v35  ;;  %v1392_v40 = vpop.permute.xlu1 %1391  ;;  %v1302_v43 = vsel %vm644_vm2, %v1290_v27, %v1301_v37 }
 0x3af   :  { %v1398_v42 = vrot.slane %v1392_v40, 4  ;;  %v2222_v7 = vcombine.low %v1270_v58, %v1302_v43  ;;  %v2223_v45 = vcombine.high %v1270_v58, %v1302_v43  ;;  %v1494_v24 = vrot.slane %v2991_v39, 4 }
 0x3b1   :  { %v1401_v17 = vsel %vm609_vm0, %v1397_v3, %v1398_v42  ;;  %1754 = vmatprep.subr.bf16.mxu0 %v2223_v45  ;;  %v1403_v23 = vsel %vm609_vm0, %v1398_v42, %v1399_v48 }
 0x3b2   :  { %v1294_v9 = vpop.permute.xlu0 %1293  ;;  %1755 = vmatpush1.bf16.msra.mxu0 %v2222_v7  ;;  %v2998_v25 = vpop.permute.xlu1 %1355  ;;  %v1402_v19 = vsel %vm166_vm5, %v1390_v18, %v1401_v17  ;;  %v1404_v11 = vsel %vm166_vm5, %v1392_v40, %v1403_v23  ;;  %v2339_v17 = vld [vmem:[%s3116_s3] sm:$0xff]  }
 0x3b3   :  { %v1361_v46 = vrot.slane %v2998_v25, 4  ;;  %v2232_v13 = vcombine.low %v2898_v38, %v1402_v19  ;;  %v2233_v49 = vcombine.high %v2898_v38, %v1402_v19  ;;  %v1493_v38 = vrot.slane %v2961_v53, 4 }
 0x3b4   :  { %v2235_v63 = vcombine.high %v2917_v33, %v1404_v11  ;;  %v2234_v16 = vcombine.low %v2917_v33, %v1404_v11  ;;  %v1298_v47 = vrot.slane %v1294_v9, 4 }
 0x3b5   :  { %v1365_v50 = vsel %vm609_vm0, %v1360_v26, %v1361_v46  ;;  %1715 = vmatprep.subr.bf16.mxu1 %v2233_v49  ;;  %v1497_v1 = vsel %vm609_vm0, %v1493_v38, %v1494_v24 }
 0x3b6   :  { %v3013_v21 = vpop.permute.xlu0 %1457  ;;  %v1424_v18 = vpop.permute.xlu1 %1423  ;;  %v1366_v59 = vsel %vm710_vm6, %v1354_v14, %v1365_v50  ;;  %1716 = vmatpush1.bf16.msra.mxu1 %v2232_v13  ;;  %v1498_v15 = vsel %vm847_vm8, %v2961_v53, %v1497_v1  ;;  %v1303_v33 = vsel %vm609_vm0, %v1297_v34, %v1298_v47 }
 0x3b7   :  { %v1430_v41 = vrot.slane %v1424_v18, 4  ;;  %v2228_v27 = vcombine.low %v1334_v57, %v1366_v59  ;;  %v2229_v32 = vcombine.high %v1334_v57, %v1366_v59  ;;  %v2245_v36 = vcombine.high %v1498_v15, %v1498_v15 }
 0x3b8   :  { %v1463_v37 = vrot.slane %v3013_v21, 4  ;;  %v1304_v34 = vsel %vm644_vm2, %v2980_v31, %v1303_v33 }
 0x3b9   :  { %1756 = vmatprep.subr.bf16.mxu0 %v2229_v32  ;;  %v1433_v6 = vsel %vm609_vm0, %v1429_v62, %v1430_v41 }
 0x3ba   :  { %v1358_v4 = vpop.permute.xlu0 %1357  ;;  %1757 = vmatpush1.bf16.msra.mxu0 %v2228_v27  ;;  %v1456_v2 = vpop.permute.xlu1 %1455  ;;  %v1434_v26 = vsel %vm781_vm1, %v2963_v55, %v1433_v6  ;;  %v2244_v55 = vcombine.low %v1498_v15, %v1498_v15 }
 0x3bb   :  { %v1462_v8 = vrot.slane %v1456_v2, 4  ;;  %1758 = vmatprep.subr.bf16.mxu0 %v2235_v63  ;;  %v1362_v3 = vrot.slane %v1358_v4, 4 }
 0x3bd   :  { %v1465_v14 = vsel %vm609_vm0, %v1461_v5, %v1462_v8  ;;  %v1467_v58 = vsel %vm609_vm0, %v1462_v8, %v1463_v37 }
 0x3be   :  { %1759 = vmatpush1.bf16.msra.mxu0 %v2234_v16  ;;  %v1262_v22 = vpop.permute.xlu1 %1261  ;;  %v1466_v54 = vsel %vm814_vm7, %v2965_v61, %v1465_v14  ;;  %v1396_v35 = vpop.permute.xlu0 %1395  ;;  %v1468_v9 = vsel %vm814_vm7, %v1456_v2, %v1467_v58 }
 0x3bf   :  { %v1266_v52 = vrot.slane %v1262_v22, 4  ;;  %v2238_v60 = vcombine.low %v1434_v26, %v1466_v54  ;;  %v2239_v56 = vcombine.high %v1434_v26, %v1466_v54  ;;  %v1400_v43 = vrot.slane %v1396_v35, 4 }
 0x3c1   :  { %v1271_v53 = vsel %vm609_vm0, %v1265_v20, %v1266_v52  ;;  %1717 = vmatprep.subr.bf16.mxu1 %v2239_v56  ;;  %v1694_v20 = vsel %vm609_vm0, %v2244_v55, 0  ;;  %v1405_v31 = vsel %vm609_vm0, %v1399_v48, %v1400_v43  ;;  %v1858_v56 = vld [vmem:[%s3119_s6] sm:$0x3f] }
 0x3c2   :  { %1718 = vmatpush1.bf16.msra.mxu1 %v2238_v60  ;;  %v1426_v61 = vpop.permute.xlu1 %1425  ;;  %v1272_v40 = vsel %vm611_vm3, %v2969_v28, %v1271_v53  ;;  %v1367_v28 = vsel %vm609_vm0, %v1361_v46, %v1362_v3  ;;  %v1460_v50 = vpop.permute.xlu0 %1459  ;;  %v1406_v59 = vsel %vm166_vm5, %v2978_v30, %v1405_v31  ;;  %v1860_v3 = vcombine.high %v1858_v56, %v1858_v56 }
 0x3c3   :  { %v1431_v42 = vrot.slane %v1426_v61, 4  ;;  %2250 = vmatprep.subr.msk.bf16.mxu1 %vm609_vm0, %v2245_v36  ;;  %v2225_v45 = vcombine.high %v1272_v40, %v1304_v34  ;;  %v2224_v11 = vcombine.low %v1272_v40, %v1304_v34  ;;  %v1368_v48 = vsel %vm710_vm6, %v2998_v25, %v1367_v28 }
 0x3c4   :  { %v2237_v62 = vcombine.high %v2920_v44, %v1406_v59  ;;  %vm2432_vm5 = vmmov 0  }
 0x3c5   :  { %v1435_v7 = vsel %vm609_vm0, %v1430_v41, %v1431_v42  ;;  %v1464_v41 = vrot.slane %v1460_v50, 4 }
 0x3c6   :  { %1720 = vmatpush1.bf16.msra.mxu1 %v1694_v20  ;;  %v1326_v19 = vpop.permute.xlu1 %1325  ;;  %v1436_v12 = vsel %vm781_vm1, %v1424_v18, %v1435_v7 }
 0x3c7   :  { %v1330_v23 = vrot.slane %v1326_v19, 4  ;;  %1797 = vmatprep.subr.bf16.mxu1 %v2225_v45  ;;  %v2240_v13 = vcombine.low %v1436_v12, %v1468_v9  ;;  %v2241_v49 = vcombine.high %v1436_v12, %v1468_v9  ;;  %v1469_v30 = vsel %vm609_vm0, %v1463_v37, %v1464_v41 }
 0x3c9   :  { %v1335_v46 = vsel %vm609_vm0, %v1329_v0, %v1330_v23  ;;  %2251 = vmatmul.mubr.msk.bf16.vlgmr.msra.gmra.mrb[4].mxu1 %vm1028_vm9, %v2339_v17  ;;  %1760 = vmatprep.subr.bf16.mxu0 %v2241_v49 }
 0x3ca   :  { %1761 = vmatpush1.bf16.msra.mxu0 %v2240_v13  ;;  %1798 = vmatpush1.bf16.msra.mxu1 %v2224_v11  ;;  %v1490_v18 = vpop.permute.xlu1 %1489  ;;  %v1336_v57 = vsel %vm677_vm4, %v2973_v10, %v1335_v46 }
 0x3cb   :  { %v1495_v27 = vrot.slane %v1490_v18, 4  ;;  %v2230_v32 = vcombine.low %v1336_v57, %v1368_v48  ;;  %v2231_v38 = vcombine.high %v1336_v57, %v1368_v48  ;;  %1829 = vmatprep.mubr.bf16.mxu1 %v2816_v29  ;;  %v2236_v29 = vcombine.low %v2920_v44, %v1406_v59 }
 0x3cd   :  { %v1499_v0 = vsel %vm609_vm0, %v1494_v24, %v1495_v27  ;;  %1799 = vmatprep.subr.bf16.mxu1 %v2231_v38 }
 0x3ce   :  { %1800 = vmatpush1.bf16.msra.mxu1 %v2230_v32  ;;  %v1428_v10 = vpop.permute.xlu1 %1427  ;;  %v1500_v25 = vsel %vm847_vm8, %v2991_v39, %v1499_v0  ;;  %v1470_v39 = vsel %vm814_vm7, %v3013_v21, %v1469_v30  ;;  %v2430_v21 = vmov 1966171168  }
 0x3cf   :  { %v1432_v63 = vrot.slane %v1428_v10, 4  ;;  %1801 = vmatprep.subr.bf16.mxu1 %v2237_v62  ;;  %v2247_v1 = vcombine.high %v1500_v25, %v1500_v25  ;;  %v2246_v4 = vcombine.low %v1500_v25, %v1500_v25  ;;  %v1862_v54 = vunpack.c.l.s4 %v2430_v21 }
 0x3d0   :  { %v2433_v21 = vmov 0.0  }
 0x3d1   :  { %v1437_v2 = vsel %vm609_vm0, %v1431_v42, %v1432_v63  ;;  %2252 = vmatprep.subr.msk.bf16.mxu0 %vm609_vm0, %v2247_v1  ;;  %v1700_v24 = vsel %vm609_vm0, %v2246_v4, 0  ;;  %v1863_v52 = vunpack.c.0.s8 %v1862_v54 }
 0x3d2   :  { %1763 = vmatpush1.bf16.msra.mxu0 %v1700_v24  ;;  %1802 = vmatpush1.bf16.msra.mxu1 %v2236_v29  ;;  %v1492_v5 = vpop.permute.xlu1 %1491  ;;  %v1438_v6 = vsel %vm781_vm1, %v1426_v61, %v1437_v2 }
 0x3d3   :  { %v1496_v8 = vrot.slane %v1492_v5, 4  ;;  %v2242_v16 = vcombine.low %v1438_v6, %v1470_v39  ;;  %v2243_v47 = vcombine.high %v1438_v6, %v1470_v39  ;;  %v1866_v60 = vsub.s32 %v1863_v52, %v2891_v51  ;;  %v1543_v51 = vpop.permute.xlu0 %1542 }
 0x3d5   :  { %v1501_v14 = vsel %vm609_vm0, %v1495_v27, %v1496_v8  ;;  %2253 = vmatmul.mubr.msk.bf16.vlgmr.msra.gmra.mrb[8].mxu0 %vm1028_vm9, %v2339_v17  ;;  %1803 = vmatprep.subr.bf16.mxu1 %v2243_v47  ;;  %v1867_v35 = vrot.slane %v1858_v56, %v1866_v60  ;;  %v1874_v61 = vrot.slane %v1860_v3, %v1866_v60 }
 0x3d6   :  { %v1502_v44 = vsel %vm847_vm8, %v1490_v18, %v1501_v14  ;;  %1804 = vmatpush1.bf16.msra.mxu1 %v2242_v16 }
 0x3d7   :  { %v2249_v15 = vcombine.high %v1502_v44, %v1502_v44  ;;  %v2248_v22 = vcombine.low %v1502_v44, %v1502_v44  ;;  %v1875_v36 = vcombine.high %v1867_v35, %v1867_v35  ;;  %v1883_v37 = vrot.slane %v1867_v35, %v1866_v60  ;;  %v2036_v44 = vld [vmem:[%s3120_s7] sm:$0xff] }
 0x3d8   :  { %v1876_v40 = vcombine.high %v1874_v61, %v1874_v61  ;;  %v1890_v43 = vrot.slane %v1874_v61, %v1866_v60  ;;  %v2256_v61 = vld [vmem:[%s3121_s8] ss:$0 sm:$0xff] }
 0x3d9   :  { %2254 = vmatprep.subr.msk.bf16.mxu1 %vm609_vm0, %v2249_v15  ;;  %v1706_v26 = vsel %vm609_vm0, %v2248_v22, 0  ;;  %v1897_v33 = vrot.slane %v1875_v36, %v1866_v60  ;;  %v1905_v55 = vcombine.high %v1883_v37, %v1883_v37  ;;  %v2037_v15 = vld [vmem:[%s3120_s7 + $0x8] sm:$0xff]  ;;  %v2431_v22 = vmov 0.0|0.0  }
 0x3da   :  { %1806 = vmatpush1.bf16.msra.mxu1 %v1706_v26  ;;  %v1904_v58 = vrot.slane %v1876_v40, %v1866_v60  ;;  %v2284_v26 = vpack.c.bf16 %v2037_v15, %v2036_v44 }
 0x3db   :  { %1913 = vmatprep.subr.bf16.mxu1 %v1897_v33  ;;  %v1906_v53 = vcombine.high %v1897_v33, %v1897_v33 }
 0x3dd   :  { %2255 = vmatmul.mubr.msk.bf16.vlgmr.msra.gmra.mrb[8].mxu1 %vm1028_vm9, %v2339_v17  ;;  %1954 = vmatprep.subr.bf16.mxu0 %v1906_v53 }
 0x3de   :  { %1955 = vmatpush1.bf16.xpose.msra.mxu0 %v1905_v55 }
 0x3df   :  { %1995 = vmatprep.subr.bf16.mxu0 %v1904_v58 }
 0x3e3   :  { %1914 = vmatpush1.bf16.xpose.msra.mxu1 %v1883_v37  ;;  %v1548_v34 = vpop.permute.xlu1 %1547 }
 0x3e4   :  { %2283 = vmatprep.subr.bf16.mxu1 %v2431_v22 }
 0x49c   :  { %v1745_v42 = vpop.f32.mrb[4].mxu1 }
 0x49d   :  { %v1746_v7 = vadd.f32 %v1745_v42, %v1543_v51  ;;  %v1747_v20 = vpop.f32.mrb[5].mxu1 }
 0x49e   :  { %v1748_v45 = vadd.f32 %v1747_v20, %v1543_v51  ;;  %v1749_v17 = vpop.f32.mrb[6].mxu1 }
 0x49f   :  { %v1750_v28 = vadd.f32 %v1749_v17, %v1548_v34  ;;  %v1751_v9 = vpop.f32.mrb[7].mxu1  ;;  %v1840_v12 = vmax.f32 %v1746_v7, 0.0 }
 0x4a0   :  { %v1752_v19 = vadd.f32 %v1751_v9, %v1548_v34  ;;  %v1841_v23 = vmax.f32 %v1748_v45, 0.0 }
 0x4a1   :  { %v1846_v31 = vmax.f32 %v1750_v28, 0.0 }
 0x4a2   :  { %v1847_v13 = vmax.f32 %v1752_v19, 0.0 }
 0x4a3   :  { %v1852_v49 = vpack.c.bf16 %v1846_v31, %v1840_v12 }
 0x4a4   :  { %v1853_v50 = vpack.c.bf16 %v1847_v13, %v1841_v23 }
 0x4a6   :  { %1945 = vmatprep.mubr.bf16.mxu1 %v1853_v50 }
 0x4a7   :  { %1946 = vmatmul.mubr.bf16.vlgmr.msra.gmra.mrb[12].mxu1 %v1852_v49 }
 0x4a8   :  { %v1788_v11 = vpop.f32.mrb[8].mxu0  ;;  %2280 = vmatprep.mubr.msk.f32.mxu1 %vm2432_vm5, %v2433_v21  ;;  %2285 = vmatpush3.bf16.msra.mxu1 %v2284_v26 }
 0x4a9   :  { %v1789_v46 = vadd.f32 %v1788_v11, %v1543_v51  ;;  %v1790_v18 = vpop.f32.mrb[9].mxu0 }
 0x4aa   :  { %v1791_v57 = vadd.f32 %v1790_v18, %v1543_v51  ;;  %v1792_v48 = vpop.f32.mrb[10].mxu0 }
 0x4ab   :  { %v1793_v59 = vadd.f32 %v1792_v48, %v1548_v34  ;;  %v1794_v41 = vpop.f32.mrb[11].mxu0  ;;  %v1842_v32 = vmax.f32 %v1789_v46, 0.0 }
 0x4ac   :  { %v1795_v27 = vadd.f32 %v1794_v41, %v1548_v34  ;;  %v1843_v0 = vmax.f32 %v1791_v57, 0.0 }
 0x4ad   :  { %v1848_v38 = vmax.f32 %v1793_v59, 0.0 }
 0x4ae   :  { %v1849_v62 = vmax.f32 %v1795_v27, 0.0 }
 0x4af   :  { %v1854_v10 = vpack.c.bf16 %v1848_v38, %v1842_v32 }
 0x4b0   :  { %v1855_v25 = vpack.c.bf16 %v1849_v62, %v1843_v0  ;;  %v1831_v30 = vpop.f32.mrb[8].mxu1 }
 0x4b1   :  { %v1832_v63 = vadd.f32 %v1831_v30, %v1543_v51  ;;  %v1833_v1 = vpop.f32.mrb[9].mxu1 }
 0x4b2   :  { %v1834_v4 = vadd.f32 %v1833_v1, %v1543_v51  ;;  %v1835_v29 = vpop.f32.mrb[10].mxu1  ;;  %1986 = vmatprep.mubr.bf16.mxu0 %v1855_v25 }
 0x4b3   :  { %v1836_v2 = vadd.f32 %v1835_v29, %v1548_v34  ;;  %v1837_v24 = vpop.f32.mrb[11].mxu1  ;;  %1987 = vmatmul.mubr.bf16.vlgmr.msra.gmra.mrb[12].mxu0 %v1854_v10  ;;  %v1844_v6 = vmax.f32 %v1832_v63, 0.0 }
 0x4b4   :  { %v1838_v5 = vadd.f32 %v1837_v24, %v1548_v34  ;;  %1996 = vmatpush1.bf16.xpose.msra.mxu0 %v1890_v43  ;;  %v1845_v8 = vmax.f32 %v1834_v4, 0.0 }
 0x4b5   :  { %v1850_v39 = vmax.f32 %v1836_v2, 0.0 }
 0x4b6   :  { %v1851_v16 = vmax.f32 %v1838_v5, 0.0 }
 0x4b7   :  { %v1856_v47 = vpack.c.bf16 %v1850_v39, %v1844_v6 }
 0x4b8   :  { %v1857_v14 = vpack.c.bf16 %v1851_v16, %v1845_v8 }
 0x4ba   :  { %2027 = vmatprep.mubr.bf16.mxu0 %v1857_v14 }
 0x4bf   :  { %2028 = vmatmul.mubr.bf16.vlgmr.msra.gmra.mrb[12].mxu0 %v1856_v47 }
 0x57a   :  { %v1947_v54 = vpop.f32.mrb[12].mxu1 }
 0x57b   :  { %v1949_v52 = vpop.f32.mrb[13].mxu1 }
 0x57c   :  { %v1950_v60 = vpop.f32.mrb[14].mxu1 }
 0x57d   :  { %v1952_v56 = vpop.f32.mrb[15].mxu1 }
 0x592   :  { %v2029_v35 = vpop.f32.mrb[12].mxu0 }
 0x593   :  { %v2286_v36 = vadd.f32 %v2029_v35, %v1947_v54  ;;  %v2031_v33 = vpop.f32.mrb[13].mxu0 }
 0x594   :  { %v2032_v37 = vpop.f32.mrb[14].mxu0 }
 0x595   :  { %v2287_v53 = vadd.f32 %v2032_v37, %v1950_v60  ;;  %v2034_v55 = vpop.f32.mrb[15].mxu0  ;;  %2045 = vxpose.xlu0.b32.start [1/2] (short) (narrow) %v2286_v36, 8 }
 0x599   :  { %2046 = vxpose.xlu0.b32.end [2/2] (short) (narrow) %v2287_v53, 8 }
 0x615   :  { %v2061_v3 = vpop.trf.xlu0 }
 0x616   :  { %2281 = vmatmul.mubr.msk.f32.vlgmr.msra.gmra.mrb[16].mxu1 %vm2077_vm10, %v2061_v3 }
 0x6e9   :  { %v2147_v40 = vpop.f32.mrb[16].mxu1 }
 0x6ea   :  { %v2148_v58 = vadd.f32 %v2256_v61, %v2147_v40  ;;  %v2282_v43 = vpop.f32.mrb[17].mxu1 }
 0x6ec   :  { %2152 = vst.msk [vmem:[#allocation9] sm:$0x3] %vm2151_vm11, %v2148_v58 }
 0x6ed   :  { %2375 = shalt.err (!%p2372_p12)
}
 0x6ee   :  { %s2376_s15 = scalar_lea.hbm %s3122_s9, 32 }
 0x6ef   :  { %p2377_p13 = scmp.ne.s32.totalorder %s3122_s9, %s2376_s15  ;;  %p2380_p0 = scmp.lt.u32.totalorder %s2376_s15, %s3122_s9 }
 0x6f1   :  { %p2382_p1 = pnand %p2380_p0, %p2377_p13 }
 0x6f3   :  { %2385 = shalt.err (!%p2382_p1)
}
 0x6f4   :  { %2162 = dma.vmem_to_hbm [thread:$0]  %s2160_s11, 32, %s3122_s9, [#allocation8]  }
 0x6f5   :  { %2388 = dma.done.wait [#allocation8], 32  }
 0x6f6   :  { %2389 = vsyncadd [#allocation8], 4294967264 }
 0x6f7   :  { %2166 = vsyncpa [#allocation7], 1 }
 0x6f8   :  { %2167 = vsyncpa [#allocation8], 1 }

</bundles_post_ra>
